<compile_context>
chip_gen: v6e
topology: v6e:2x2x1
jax: 0.10.0
libtpu: 0.0.40
codegen_flags: <defaults>
</compile_context>

<pallas_src>
import math
import functools

import jax
import jax.numpy as jnp
from jax.experimental import pallas as pl
from jax.experimental.pallas import tpu as pltpu


# ----------------------------- shared math helpers ---------------------------

_SQRT_2_OVER_PI = 0.7978845608028654


def _gelu(x):
    # tanh-approximation GELU: tanh executes in the (otherwise idle) EUP slot,
    # whereas erf lowers to a VALU polynomial. Numerically ~1e-3 of exact GELU.
    return 0.5 * x * (1.0 + jnp.tanh(_SQRT_2_OVER_PI * (x + 0.044715 * x * x * x)))


def _elu_plus_one(x):
    # F.elu(x) + 1  (alpha = 1); exp goes to the EUP.
    return jnp.where(x > 0, x + 1.0, jnp.exp(jnp.minimum(x, 0.0)))


def _layernorm(x, w, b, eps=1e-5):
    mu = jnp.mean(x, axis=-1, keepdims=True)
    var = jnp.mean((x - mu) ** 2, axis=-1, keepdims=True)
    return (x - mu) * jax.lax.rsqrt(var + eps) * w + b


# ----------------------------- fused DEN kernel -------------------------------

def den_kernel(patches_ref, w_patch_ref, pe_ref,        # patch embed (layer 0 only)
               w_all_ref, vecs_ref, convs_ref,          # per-layer params (leading layer dim)
               w_head_ref, b_head_ref,                  # classifier head (last layer only)
               out_ref,                                 # (imgs, classes_padded) logits
               x_ref, nf_ref, nl_ref,                   # persistent VMEM scratch
               *, imgs, n_tok):
    l = pl.program_id(1)
    depth = pl.num_programs(1)
    ROWS, D = x_ref.shape                               # ROWS = imgs * n_tok

    # ---- layer 0 (once per row block): patch projection + positional encoding
    # and the layer-invariant image-boundary masks (hoisted into scratch). ----
    @pl.when(l == 0)
    def _():
        x_ref[...] = (jnp.dot(patches_ref[...], w_patch_ref[...],
                              preferred_element_type=jnp.float32)
                      + pe_ref[...])
        tok = jax.lax.broadcasted_iota(jnp.int32, (ROWS, 1), 0) % n_tok
        nf_ref[...] = jnp.where(tok != 0, 1.0, 0.0)             # token has a predecessor
        nl_ref[...] = jnp.where(tok != n_tok - 1, 1.0, 0.0)     # token has a successor

    x = x_ref[...]                                      # (ROWS, D) f32
    nf = nf_ref[...]                                    # (ROWS, 1) f32
    nl = nl_ref[...]

    def vrow(i):                                        # per-layer bias / LN row
        return vecs_ref[0, i]                           # (D,) f32

    def dwconv3(h, ci, bias):
        # depthwise Conv1d(kernel=3, padding=1, groups=D) along the token axis,
        # via XLU rolls + image-boundary mask multiplies (no (N,N) matmuls).
        # NOTE: only valid for kernel=3 / stride=1 / padding=1; the masks stop
        # the circular roll from leaking across images in the [B*N, D] layout.
        w0 = convs_ref[0, ci, 0]
        w1 = convs_ref[0, ci, 1]
        w2 = convs_ref[0, ci, 2]
        h_prev = pltpu.roll(h, shift=1, axis=0) * nf            # h[n-1], 0 at image start
        h_next = pltpu.roll(h, shift=ROWS - 1, axis=0) * nl     # h[n+1], 0 at image end
        return h_prev * w0 + h * w1 + h_next * w2 + bias

    # 1) residual + diffusion update: delta_t * (depthwise_conv(x) - x)
    h = x + vrow(16) * (dwconv3(x, 0, vrow(0)) - x)

    # 3) token mixer: LN -> dwconv -> GELU -> dwconv (done early so the LN temp
    #    retires before the big matmul; shortens live ranges).
    xn = _layernorm(x, vrow(3), vrow(4))
    h = h + dwconv3(_gelu(dwconv3(xn, 1, vrow(5))), 2, vrow(6))

    # 2 + 4a) one packed bf16 matmul over x: columns = [local_fc1 | Wq | Wk | Wv]
    big = jnp.dot(x.astype(jnp.bfloat16), w_all_ref[0, :, 0:4 * D],
                  preferred_element_type=jnp.float32)           # (ROWS, 4D)

    # 2b) local update (per-token MLP, second linear)
    local_mid = _gelu(big[:, 0:D] + vrow(1)).astype(jnp.bfloat16)
    h = h + jnp.dot(local_mid, w_all_ref[0, :, 4 * D:5 * D],
                    preferred_element_type=jnp.float32) + vrow(2)

    # 4b) simple linear attention — batched over the images in this row block
    #     (one batched dot_general instead of a per-image loop + concat).
    #     Kept in f32: the normalization denominator is precision-sensitive.
    q = _elu_plus_one(big[:, D:2 * D] + vrow(7)).reshape(imgs, n_tok, D)
    k = _elu_plus_one(big[:, 2 * D:3 * D] + vrow(8)).reshape(imgs, n_tok, D)
    v = (big[:, 3 * D:4 * D] + vrow(9)).reshape(imgs, n_tok, D)
    kv = jax.lax.dot_general(k, v, (((1,), (1,)), ((0,), (0,))),
                             preferred_element_type=jnp.float32)     # (imgs, D, D)
    numer = jax.lax.dot_general(q, kv, (((2,), (1,)), ((0,), (0,))),
                                preferred_element_type=jnp.float32)  # (imgs, n_tok, D)
    k_sum = jnp.sum(k, axis=1, keepdims=True)                        # (imgs, 1, D)
    denom = jnp.sum(q * k_sum, axis=2, keepdims=True) + 1e-6         # (imgs, n_tok, 1)
    h = h + (numer / denom).reshape(ROWS, D)

    # combine + norm1 + FFN + norm2
    h = _layernorm(h, vrow(12), vrow(13))
    ff_mid = _gelu(jnp.dot(h.astype(jnp.bfloat16), w_all_ref[0, :, 5 * D:6 * D],
                           preferred_element_type=jnp.float32) + vrow(10))
    h = h + jnp.dot(ff_mid.astype(jnp.bfloat16), w_all_ref[0, :, 6 * D:7 * D],
                    preferred_element_type=jnp.float32) + vrow(11)
    h = _layernorm(h, vrow(14), vrow(15))

    x_ref[...] = h                                      # carried to the next layer in VMEM

    # ---- last layer: fused mean-pool over tokens + classification head ----
    @pl.when(l == depth - 1)
    def _():
        pooled = jnp.mean(h.reshape(imgs, n_tok, D), axis=1)         # (imgs, D)
        out_ref[...] = (jnp.dot(pooled.astype(jnp.bfloat16), w_head_ref[...],
                                preferred_element_type=jnp.float32)
                        + b_head_ref[...])


# ----------------------------- wrapper ----------------------------------------

def get_sinusoid_encoding(n_position, d_model):
    position = jnp.arange(n_position, dtype=jnp.float32)[:, None]
    div_term = jnp.exp(jnp.arange(0, d_model, 2, dtype=jnp.float32)
                       * -(math.log(10000.0) / d_model))
    pe = jnp.zeros((n_position, d_model), dtype=jnp.float32)
    pe = pe.at[:, 0::2].set(jnp.sin(position * div_term))
    pe = pe.at[:, 1::2].set(jnp.cos(position * div_term))
    return pe


def _extract_patches(x_img, ps):
    # (B,C,H,W) -> (B*N, C*ps*ps) with features ordered (C, ps, ps): this is
    # exactly the flattened Conv2d(kernel=ps, stride=ps) patch projection.
    B, C, H, W = x_img.shape
    n_tok = (H // ps) * (W // ps)
    return (x_img.reshape(B, C, H // ps, ps, W // ps, ps)
            .transpose(0, 2, 4, 1, 3, 5)
            .reshape(B * n_tok, C * ps * ps))


def _round_up(x, m):
    return (x + m - 1) // m * m


def den_forward(x_img, params, *, target_rows_per_block=256):
    B, C, H, W = x_img.shape
    ps = params["patch_size"]
    n_tok = (H // ps) * (W // ps)
    P = C * ps * ps
    depth, D, _ = params["w_all"].shape
    num_classes = params["w_head"].shape[1]

    # lane-dense padding of the small dims (patch features, classes)
    P_pad = _round_up(P, 128)
    C_pad = _round_up(num_classes, 128)

    # Row-block tiling of the flattened [B*N] rows, in units of whole images
    # (attention / conv / pool never cross images). ~256 rows per block feeds
    # the 256-wide MXUs on v6e/v7x; the row axis is "parallel" for megacore.
    imgs = max(1, min(B, target_rows_per_block // n_tok))
    while B % imgs:
        imgs -= 1
    num_blocks = B // imgs
    ROWS = imgs * n_tok
    assert num_blocks == 1 or (ROWS % 8 == 0 and imgs % 8 == 0), (
        "row blocks must be sublane-aligned when the grid has more than one block")

    # ---- layout glue (pure JAX, once) ----
    patches = jnp.pad(_extract_patches(x_img, ps).astype(jnp.bfloat16),
                      ((0, 0), (0, P_pad - P)))                       # (B*N, P_pad) bf16
    w_patch = jnp.pad(params["w_patch"], ((0, P_pad - P), (0, 0)))    # (P_pad, D) bf16
    pe = jnp.tile(params["pos"], (B, 1)) + params["b_patch"]          # (B*N, D) f32
    w_head = jnp.pad(params["w_head"], ((0, 0), (0, C_pad - num_classes)))
    b_head = jnp.pad(params["b_head"], ((0, 0), (0, C_pad - num_classes)))

    kernel = functools.partial(den_kernel, imgs=imgs, n_tok=n_tok)

    logits_padded = pl.pallas_call(
        kernel,
        out_shape=jax.ShapeDtypeStruct((B, C_pad), jnp.float32),
        grid=(num_blocks, depth),
        in_specs=[
            pl.BlockSpec((ROWS, P_pad), lambda rb, l: (rb, 0)),       # patches (bf16)
            pl.BlockSpec((P_pad, D), lambda rb, l: (0, 0)),           # w_patch (bf16)
            pl.BlockSpec((ROWS, D), lambda rb, l: (rb, 0)),           # pos + patch bias
            pl.BlockSpec((1, D, 7 * D), lambda rb, l: (l, 0, 0)),     # packed layer mats
            pl.BlockSpec((1, 17, D), lambda rb, l: (l, 0, 0)),        # biases / LN / delta_t
            pl.BlockSpec((1, 3, 3, D), lambda rb, l: (l, 0, 0, 0)),   # depthwise conv taps
            pl.BlockSpec((D, C_pad), lambda rb, l: (0, 0)),           # w_head (bf16)
            pl.BlockSpec((1, C_pad), lambda rb, l: (0, 0)),           # b_head
        ],
        out_specs=pl.BlockSpec((imgs, C_pad), lambda rb, l: (rb, 0)),
        scratch_shapes=[
            pltpu.VMEM((ROWS, D), jnp.float32),    # persistent activations per row block
            pltpu.VMEM((ROWS, 1), jnp.float32),    # not-first-token-of-image mask
            pltpu.VMEM((ROWS, 1), jnp.float32),    # not-last-token-of-image mask
        ],
        compiler_params=pltpu.CompilerParams(
            dimension_semantics=("parallel", "arbitrary"),   # row blocks ||, layers seq.
            vmem_limit_bytes=32 * 1024 * 1024,
        ),
    )(patches, w_patch, pe,
      params["w_all"], params["vecs"], params["convs"],
      w_head, b_head)

    return logits_padded[:, :num_classes]


# ----------------------------- pure-JAX reference -----------------------------

def den_reference(x_img, params):
    """Plain-JAX forward pass of the same model (for validation)."""
    B, C, H, W = x_img.shape
    ps = params["patch_size"]
    n_tok = (H // ps) * (W // ps)
    depth, D, _ = params["w_all"].shape
    P = C * ps * ps

    x = (_extract_patches(x_img, ps).reshape(B, n_tok, P)
         @ params["w_patch"].astype(jnp.float32))
    x = x + params["pos"][None] + params["b_patch"]

    w_all = params["w_all"].astype(jnp.float32)
    for li in range(depth):
        W7 = w_all[li]
        vec = params["vecs"][li]
        conv = params["convs"][li]

        def dw(h, ci, bias):
            prev = jnp.pad(h, ((0, 0), (1, 0), (0, 0)))[:, :-1]
            nxt = jnp.pad(h, ((0, 0), (0, 1), (0, 0)))[:, 1:]
            return prev * conv[ci, 0] + h * conv[ci, 1] + nxt * conv[ci, 2] + bias

        diff = vec[16] * (dw(x, 0, vec[0]) - x)
        local = _gelu(x @ W7[:, 0:D] + vec[1]) @ W7[:, 4 * D:5 * D] + vec[2]
        token = dw(_gelu(dw(_layernorm(x, vec[3], vec[4]), 1, vec[5])), 2, vec[6])
        q = _elu_plus_one(x @ W7[:, D:2 * D] + vec[7])
        k = _elu_plus_one(x @ W7[:, 2 * D:3 * D] + vec[8])
        v = x @ W7[:, 3 * D:4 * D] + vec[9]
        kv = jnp.einsum('bnd,bne->bde', k, v)
        numer = jnp.einsum('bnd,bde->bne', q, kv)
        denom = jnp.einsum('bnd,bd->bn', q, k.sum(axis=1))[..., None] + 1e-6
        attn = numer / denom

        x = x + diff + local + token + attn
        x = _layernorm(x, vec[12], vec[13])
        x = x + _gelu(x @ W7[:, 5 * D:6 * D] + vec[10]) @ W7[:, 6 * D:7 * D] + vec[11]
        x = _layernorm(x, vec[14], vec[15])

    pooled = x.mean(axis=1)
    return pooled @ params["w_head"].astype(jnp.float32) + params["b_head"]


# ----------------------------- parameter construction -------------------------

def init_params(key, *, in_chans, patch_size, embed_dim, depth, num_classes, n_tok):
    D = embed_dim
    P = in_chans * patch_size * patch_size
    kp, kh, *kl = jax.random.split(key, 2 + depth)
    scale = 0.05

    ones = jnp.ones((D,), jnp.float32)
    zeros = jnp.zeros((D,), jnp.float32)
    delta_t = jnp.full((D,), 0.1, jnp.float32)       # nn.Parameter(0.1), replicated

    w_all_layers, vecs_layers, convs_layers = [], [], []
    for k in kl:
        keys = jax.random.split(k, 12)

        def mat(kk):
            return scale * jax.random.normal(kk, (D, D), dtype=jnp.float32)

        def vec(kk):
            return scale * jax.random.normal(kk, (D,), dtype=jnp.float32)

        # column-packed matmul weights (stored (in, out)):
        # [local_fc1 | Wq | Wk | Wv | local_fc2 | ff_fc1 | ff_fc2]
        w_all_layers.append(jnp.concatenate([mat(keys[i]) for i in range(7)], axis=1))
        # depthwise conv taps: [diffusion, tm_conv1, tm_conv2] x [tap0,tap1,tap2] x D
        convs_layers.append(scale * jax.random.normal(keys[7], (3, 3, D), jnp.float32))
        vecs_layers.append(jnp.stack([
            vec(keys[8]),    # 0  diffusion_conv bias
            vec(keys[9]),    # 1  local fc1 bias
            vec(keys[10]),   # 2  local fc2 bias
            ones, zeros,     # 3,4  token_mixer LN weight / bias
            vec(keys[11]),   # 5  tm conv1 bias
            zeros,           # 6  tm conv2 bias
            zeros, zeros, zeros,   # 7,8,9  q / k / v bias
            zeros,           # 10 ff fc1 bias
            zeros,           # 11 ff fc2 bias
            ones, zeros,     # 12,13 norm1 weight / bias
            ones, zeros,     # 14,15 norm2 weight / bias
            delta_t,         # 16 delta_t (replicated scalar)
        ], axis=0))

    return {
        "patch_size": patch_size,
        "w_patch": (scale * jax.random.normal(kp, (P, D), jnp.float32)).astype(jnp.bfloat16),
        "b_patch": jnp.zeros((D,), jnp.float32),
        "pos": get_sinusoid_encoding(n_tok, D),
        "w_all": jnp.stack(w_all_layers).astype(jnp.bfloat16),   # (depth, D, 7D)
        "vecs": jnp.stack(vecs_layers),                          # (depth, 17, D)
        "convs": jnp.stack(convs_layers),                        # (depth, 3, 3, D)
        "w_head": (scale * jax.random.normal(kh, (D, num_classes), jnp.float32)
                   ).astype(jnp.bfloat16),
        "b_head": jnp.zeros((1, num_classes), jnp.float32),
    }


# ----------------------------- main --------------------------------------------

if __name__ == "__main__":
    B, C, H, W = 2, 3, 16, 16
    patch_size = 4
    embed_dim = 128            # lane-dense (multiple of 128)
    depth = 2
    num_classes = 10
    n_tok = (H // patch_size) * (W // patch_size)   # 16 tokens per image

    key = jax.random.PRNGKey(0)
    k_img, k_params = jax.random.split(key)
    x_img = jax.random.normal(k_img, (B, C, H, W), dtype=jnp.float32)
    params = init_params(k_params, in_chans=C, patch_size=patch_size,
                         embed_dim=embed_dim, depth=depth,
                         num_classes=num_classes, n_tok=n_tok)

    out = jax.block_until_ready(den_forward(x_img, params))
    assert out.shape == (B, num_classes), out.shape
    assert bool(jnp.all(jnp.isfinite(out)))

    # Validate against the pure-JAX reference (kernel matmuls run in bf16 with
    # f32 accumulation, so allow a loose absolute tolerance).
    ref = den_reference(x_img, params)
    max_err = float(jnp.max(jnp.abs(out - ref)))
    assert max_err < 5e-2, f"kernel vs reference mismatch: max |diff| = {max_err}"

    print("KERNEL_OK")
</pallas_src>

<mosaic_0001>
module attributes {stable_mosaic.version = 11 : i64} {
  func.func @den_kernel(%arg0: i32, %arg1: i32, %arg2: memref<32x128xbf16, #tpu.memory_space<vmem>>, %arg3: memref<128x128xbf16, #tpu.memory_space<vmem>>, %arg4: memref<32x128xf32, #tpu.memory_space<vmem>>, %arg5: memref<1x128x896xbf16, #tpu.memory_space<vmem>>, %arg6: memref<1x17x128xf32, #tpu.memory_space<vmem>>, %arg7: memref<1x3x3x128xf32, #tpu.memory_space<vmem>>, %arg8: memref<128x128xbf16, #tpu.memory_space<vmem>>, %arg9: memref<1x128xf32, #tpu.memory_space<vmem>>, %arg10: memref<2x128xf32, #tpu.memory_space<vmem>>, %arg11: memref<32x128xf32, #tpu.memory_space<vmem>>, %arg12: memref<32x1xf32, #tpu.memory_space<vmem>>, %arg13: memref<32x1xf32, #tpu.memory_space<vmem>>) attributes {dimension_semantics = [#tpu.dimension_semantics<parallel>, #tpu.dimension_semantics<arbitrary>], iteration_bounds = array<i64: 1, 2>, scalar_prefetch = 0 : i64, scratch_operands = 3 : i64, tpu.core_type = #tpu.core_type<tc>, window_params = [{transform_indices = @transform_0, window_bounds = array<i64: 32, 128>}, {pipeline_mode = #tpu.pipeline_mode<synchronous>, transform_indices = @transform_1, window_bounds = array<i64: 128, 128>}, {transform_indices = @transform_2, window_bounds = array<i64: 32, 128>}, {transform_indices = @transform_3, window_bounds = array<i64: 1, 128, 896>}, {transform_indices = @transform_4, window_bounds = array<i64: 1, 17, 128>}, {transform_indices = @transform_5, window_bounds = array<i64: 1, 3, 3, 128>}, {pipeline_mode = #tpu.pipeline_mode<synchronous>, transform_indices = @transform_6, window_bounds = array<i64: 128, 128>}, {pipeline_mode = #tpu.pipeline_mode<synchronous>, transform_indices = @transform_7, window_bounds = array<i64: 1, 128>}, {transform_indices = @transform_8, window_bounds = array<i64: 2, 128>}]} {
    %c0_i32 = arith.constant 0 : i32
    %0 = arith.cmpi eq, %arg1, %c0_i32 : i32
    %1 = arith.extui %0 : i1 to i32
    %c0_i32_0 = arith.constant 0 : i32
    %2 = arith.cmpi ne, %1, %c0_i32_0 : i32
    scf.if %2 {
      %c0_135 = arith.constant 0 : index
      %c0_136 = arith.constant 0 : index
      %315 = vector.load %arg2[%c0_135, %c0_136] : memref<32x128xbf16, #tpu.memory_space<vmem>>, vector<32x128xbf16>
      %c0_137 = arith.constant 0 : index
      %c0_138 = arith.constant 0 : index
      %316 = vector.load %arg3[%c0_137, %c0_138] : memref<128x128xbf16, #tpu.memory_space<vmem>>, vector<128x128xbf16>
      %cst_139 = arith.constant dense<0.000000e+00> : vector<32x128xf32>
      %317 = tpu.matmul %315, %316, %cst_139 {dimension_numbers = #tpu.dot_dimension_numbers<[1], [0], [0], [1], [0, 0, 1, 1], [], []>} : vector<32x128xbf16>, vector<128x128xbf16>, vector<32x128xf32> -> vector<32x128xf32>
      %c0_140 = arith.constant 0 : index
      %c0_141 = arith.constant 0 : index
      %318 = vector.load %arg4[%c0_140, %c0_141] : memref<32x128xf32, #tpu.memory_space<vmem>>, vector<32x128xf32>
      %319 = arith.addf %317, %318 : vector<32x128xf32>
      %c0_142 = arith.constant 0 : index
      %c0_143 = arith.constant 0 : index
      %320 = vector.load %arg11[%c0_142, %c0_143] : memref<32x128xf32, #tpu.memory_space<vmem>>, vector<32x128xf32>
      tpu.vector_store %arg11[%c0_142, %c0_143], %319 {strides = array<i32>} : memref<32x128xf32, #tpu.memory_space<vmem>>, vector<32x128xf32>,
      %321 = tpu.iota {dimensions = array<i32: 0>} : vector<32x1xi32>
      %c16_i32 = arith.constant 16 : i32
      %c0_i32_144 = arith.constant 0 : i32
      %322 = arith.cmpi eq, %c16_i32, %c0_i32_144 : i32
      %c1_i32_145 = arith.constant 1 : i32
      %323 = arith.select %322, %c1_i32_145, %c16_i32 : i32
      %324 = vector.broadcast %323 : i32 to vector<32x1xi32>
      %325 = arith.remsi %321, %324 : vector<32x1xi32>
      %c0_i32_146 = arith.constant 0 : i32
      %326 = vector.broadcast %c0_i32_146 : i32 to vector<32x1xi32>
      %327 = arith.cmpi ne, %325, %326 : vector<32x1xi32>
      %c0_i32_147 = arith.constant 0 : i32
      %328 = vector.broadcast %c0_i32_147 : i32 to vector<32x1xi32>
      %329 = arith.cmpi slt, %325, %328 : vector<32x1xi32>
      %c0_i32_148 = arith.constant 0 : i32
      %330 = arith.cmpi slt, %323, %c0_i32_148 : i32
      %331 = vector.broadcast %330 : i1 to vector<32x1xi1>
      %332 = vector.broadcast %331 : vector<32x1xi1> to vector<32x1xi1>
      %333 = arith.xori %329, %332 : vector<32x1xi1>
      %334 = arith.andi %333, %327 : vector<32x1xi1>
      %335 = vector.broadcast %323 : i32 to vector<32x1xi32>
      %336 = arith.addi %325, %335 : vector<32x1xi32>
      %337 = arith.select %334, %336, %325 : vector<32x1xi1>, vector<32x1xi32>
      %c0_i32_149 = arith.constant 0 : i32
      %338 = vector.broadcast %c0_i32_149 : i32 to vector<32x1xi32>
      %339 = arith.cmpi ne, %337, %338 : vector<32x1xi32>
      %cst_150 = arith.constant 1.000000e+00 : f32
      %cst_151 = arith.constant 0.000000e+00 : f32
      %340 = vector.broadcast %cst_150 : f32 to vector<32x1xf32>
      %341 = vector.broadcast %cst_151 : f32 to vector<32x1xf32>
      %342 = arith.select %339, %340, %341 : vector<32x1xi1>, vector<32x1xf32>
      %c0_152 = arith.constant 0 : index
      %c0_153 = arith.constant 0 : index
      %343 = vector.load %arg12[%c0_152, %c0_153] : memref<32x1xf32, #tpu.memory_space<vmem>>, vector<32x1xf32>
      tpu.vector_store %arg12[%c0_152, %c0_153], %342 {strides = array<i32>} : memref<32x1xf32, #tpu.memory_space<vmem>>, vector<32x1xf32>,
      %c15_i32 = arith.constant 15 : i32
      %344 = vector.broadcast %c15_i32 : i32 to vector<32x1xi32>
      %345 = arith.cmpi ne, %337, %344 : vector<32x1xi32>
      %cst_154 = arith.constant 1.000000e+00 : f32
      %cst_155 = arith.constant 0.000000e+00 : f32
      %346 = vector.broadcast %cst_154 : f32 to vector<32x1xf32>
      %347 = vector.broadcast %cst_155 : f32 to vector<32x1xf32>
      %348 = arith.select %345, %346, %347 : vector<32x1xi1>, vector<32x1xf32>
      %c0_156 = arith.constant 0 : index
      %c0_157 = arith.constant 0 : index
      %349 = vector.load %arg13[%c0_156, %c0_157] : memref<32x1xf32, #tpu.memory_space<vmem>>, vector<32x1xf32>
      tpu.vector_store %arg13[%c0_156, %c0_157], %348 {strides = array<i32>} : memref<32x1xf32, #tpu.memory_space<vmem>>, vector<32x1xf32>,
    } else {
    }
    %c0 = arith.constant 0 : index
    %c0_1 = arith.constant 0 : index
    %3 = vector.load %arg11[%c0, %c0_1] : memref<32x128xf32, #tpu.memory_space<vmem>>, vector<32x128xf32>
    %c0_2 = arith.constant 0 : index
    %c0_3 = arith.constant 0 : index
    %4 = vector.load %arg12[%c0_2, %c0_3] : memref<32x1xf32, #tpu.memory_space<vmem>>, vector<32x1xf32>
    %c0_4 = arith.constant 0 : index
    %c0_5 = arith.constant 0 : index
    %5 = vector.load %arg13[%c0_4, %c0_5] : memref<32x1xf32, #tpu.memory_space<vmem>>, vector<32x1xf32>
    %c0_6 = arith.constant 0 : index
    %c16 = arith.constant 16 : index
    %c0_7 = arith.constant 0 : index
    %6 = vector.load %arg6[%c0_6, %c16, %c0_7] : memref<1x17x128xf32, #tpu.memory_space<vmem>>, vector<1x1x128xf32>
    %7 = vector.shape_cast %6 : vector<1x1x128xf32> to vector<128xf32>
    %c0_8 = arith.constant 0 : index
    %c0_9 = arith.constant 0 : index
    %c0_10 = arith.constant 0 : index
    %8 = vector.load %arg6[%c0_8, %c0_9, %c0_10] : memref<1x17x128xf32, #tpu.memory_space<vmem>>, vector<1x1x128xf32>
    %9 = vector.shape_cast %8 : vector<1x1x128xf32> to vector<128xf32>
    %c0_11 = arith.constant 0 : index
    %c0_12 = arith.constant 0 : index
    %c0_13 = arith.constant 0 : index
    %c0_14 = arith.constant 0 : index
    %10 = vector.load %arg7[%c0_11, %c0_12, %c0_13, %c0_14] : memref<1x3x3x128xf32, #tpu.memory_space<vmem>>, vector<1x1x1x128xf32>
    %11 = vector.shape_cast %10 : vector<1x1x1x128xf32> to vector<128xf32>
    %c0_15 = arith.constant 0 : index
    %c0_16 = arith.constant 0 : index
    %c1 = arith.constant 1 : index
    %c0_17 = arith.constant 0 : index
    %12 = vector.load %arg7[%c0_15, %c0_16, %c1, %c0_17] : memref<1x3x3x128xf32, #tpu.memory_space<vmem>>, vector<1x1x1x128xf32>
    %13 = vector.shape_cast %12 : vector<1x1x1x128xf32> to vector<128xf32>
    %c0_18 = arith.constant 0 : index
    %c0_19 = arith.constant 0 : index
    %c2 = arith.constant 2 : index
    %c0_20 = arith.constant 0 : index
    %14 = vector.load %arg7[%c0_18, %c0_19, %c2, %c0_20] : memref<1x3x3x128xf32, #tpu.memory_space<vmem>>, vector<1x1x1x128xf32>
    %15 = vector.shape_cast %14 : vector<1x1x1x128xf32> to vector<128xf32>
    %c1_i32 = arith.constant 1 : i32
    %16 = tpu.dynamic_rotate %3 by %c1_i32 dim 0 : vector<32x128xf32>, i32 -> vector<32x128xf32>
    %17 = vector.broadcast %4 : vector<32x1xf32> to vector<32x128xf32>
    %18 = arith.mulf %16, %17 : vector<32x128xf32>
    %c31_i32 = arith.constant 31 : i32
    %19 = tpu.dynamic_rotate %3 by %c31_i32 dim 0 : vector<32x128xf32>, i32 -> vector<32x128xf32>
    %20 = vector.broadcast %5 : vector<32x1xf32> to vector<32x128xf32>
    %21 = arith.mulf %19, %20 : vector<32x128xf32>
    %22 = vector.shape_cast %11 : vector<128xf32> to vector<1x128xf32>
    %23 = vector.broadcast %22 : vector<1x128xf32> to vector<32x128xf32>
    %24 = arith.mulf %18, %23 : vector<32x128xf32>
    %25 = vector.shape_cast %13 : vector<128xf32> to vector<1x128xf32>
    %26 = vector.broadcast %25 : vector<1x128xf32> to vector<32x128xf32>
    %27 = arith.mulf %3, %26 : vector<32x128xf32>
    %28 = arith.addf %24, %27 : vector<32x128xf32>
    %29 = vector.shape_cast %15 : vector<128xf32> to vector<1x128xf32>
    %30 = vector.broadcast %29 : vector<1x128xf32> to vector<32x128xf32>
    %31 = arith.mulf %21, %30 : vector<32x128xf32>
    %32 = arith.addf %28, %31 : vector<32x128xf32>
    %33 = vector.shape_cast %9 : vector<128xf32> to vector<1x128xf32>
    %34 = vector.broadcast %33 : vector<1x128xf32> to vector<32x128xf32>
    %35 = arith.addf %32, %34 : vector<32x128xf32>
    %36 = arith.subf %35, %3 : vector<32x128xf32>
    %37 = vector.shape_cast %7 : vector<128xf32> to vector<1x128xf32>
    %38 = vector.broadcast %37 : vector<1x128xf32> to vector<32x128xf32>
    %39 = arith.mulf %38, %36 : vector<32x128xf32>
    %40 = arith.addf %3, %39 : vector<32x128xf32>
    %c0_21 = arith.constant 0 : index
    %c3 = arith.constant 3 : index
    %c0_22 = arith.constant 0 : index
    %41 = vector.load %arg6[%c0_21, %c3, %c0_22] : memref<1x17x128xf32, #tpu.memory_space<vmem>>, vector<1x1x128xf32>
    %42 = vector.shape_cast %41 : vector<1x1x128xf32> to vector<128xf32>
    %c0_23 = arith.constant 0 : index
    %c4 = arith.constant 4 : index
    %c0_24 = arith.constant 0 : index
    %43 = vector.load %arg6[%c0_23, %c4, %c0_24] : memref<1x17x128xf32, #tpu.memory_space<vmem>>, vector<1x1x128xf32>
    %44 = vector.shape_cast %43 : vector<1x1x128xf32> to vector<128xf32>
    %cst = arith.constant dense<0.000000e+00> : vector<32xf32>
    %45 = vector.multi_reduction <add>, %3, %cst [1] : vector<32x128xf32> to vector<32xf32>
    %46 = vector.shape_cast %45 : vector<32xf32> to vector<32x1xf32>
    %cst_25 = arith.constant 1.280000e+02 : f32
    %47 = vector.broadcast %cst_25 : f32 to vector<32x1xf32>
    %48 = arith.divf %46, %47 : vector<32x1xf32>
    %49 = vector.broadcast %48 : vector<32x1xf32> to vector<32x128xf32>
    %50 = arith.subf %3, %49 : vector<32x128xf32>
    %51 = arith.mulf %50, %50 : vector<32x128xf32>
    %cst_26 = arith.constant dense<0.000000e+00> : vector<32xf32>
    %52 = vector.multi_reduction <add>, %51, %cst_26 [1] : vector<32x128xf32> to vector<32xf32>
    %53 = vector.shape_cast %52 : vector<32xf32> to vector<32x1xf32>
    %cst_27 = arith.constant 1.280000e+02 : f32
    %54 = vector.broadcast %cst_27 : f32 to vector<32x1xf32>
    %55 = arith.divf %53, %54 : vector<32x1xf32>
    %56 = vector.broadcast %48 : vector<32x1xf32> to vector<32x128xf32>
    %57 = arith.subf %3, %56 : vector<32x128xf32>
    %cst_28 = arith.constant 9.99999974E-6 : f32
    %58 = vector.broadcast %cst_28 : f32 to vector<32x1xf32>
    %59 = arith.addf %55, %58 : vector<32x1xf32>
    %60 = math.rsqrt %59 : vector<32x1xf32>
    %61 = vector.broadcast %60 : vector<32x1xf32> to vector<32x128xf32>
    %62 = arith.mulf %57, %61 : vector<32x128xf32>
    %63 = vector.shape_cast %42 : vector<128xf32> to vector<1x128xf32>
    %64 = vector.broadcast %63 : vector<1x128xf32> to vector<32x128xf32>
    %65 = arith.mulf %62, %64 : vector<32x128xf32>
    %66 = vector.shape_cast %44 : vector<128xf32> to vector<1x128xf32>
    %67 = vector.broadcast %66 : vector<1x128xf32> to vector<32x128xf32>
    %68 = arith.addf %65, %67 : vector<32x128xf32>
    %c0_29 = arith.constant 0 : index
    %c5 = arith.constant 5 : index
    %c0_30 = arith.constant 0 : index
    %69 = vector.load %arg6[%c0_29, %c5, %c0_30] : memref<1x17x128xf32, #tpu.memory_space<vmem>>, vector<1x1x128xf32>
    %70 = vector.shape_cast %69 : vector<1x1x128xf32> to vector<128xf32>
    %c0_31 = arith.constant 0 : index
    %c1_32 = arith.constant 1 : index
    %c0_33 = arith.constant 0 : index
    %c0_34 = arith.constant 0 : index
    %71 = vector.load %arg7[%c0_31, %c1_32, %c0_33, %c0_34] : memref<1x3x3x128xf32, #tpu.memory_space<vmem>>, vector<1x1x1x128xf32>
    %72 = vector.shape_cast %71 : vector<1x1x1x128xf32> to vector<128xf32>
    %c0_35 = arith.constant 0 : index
    %c1_36 = arith.constant 1 : index
    %c1_37 = arith.constant 1 : index
    %c0_38 = arith.constant 0 : index
    %73 = vector.load %arg7[%c0_35, %c1_36, %c1_37, %c0_38] : memref<1x3x3x128xf32, #tpu.memory_space<vmem>>, vector<1x1x1x128xf32>
    %74 = vector.shape_cast %73 : vector<1x1x1x128xf32> to vector<128xf32>
    %c0_39 = arith.constant 0 : index
    %c1_40 = arith.constant 1 : index
    %c2_41 = arith.constant 2 : index
    %c0_42 = arith.constant 0 : index
    %75 = vector.load %arg7[%c0_39, %c1_40, %c2_41, %c0_42] : memref<1x3x3x128xf32, #tpu.memory_space<vmem>>, vector<1x1x1x128xf32>
    %76 = vector.shape_cast %75 : vector<1x1x1x128xf32> to vector<128xf32>
    %c1_i32_43 = arith.constant 1 : i32
    %77 = tpu.dynamic_rotate %68 by %c1_i32_43 dim 0 : vector<32x128xf32>, i32 -> vector<32x128xf32>
    %78 = vector.broadcast %4 : vector<32x1xf32> to vector<32x128xf32>
    %79 = arith.mulf %77, %78 : vector<32x128xf32>
    %c31_i32_44 = arith.constant 31 : i32
    %80 = tpu.dynamic_rotate %68 by %c31_i32_44 dim 0 : vector<32x128xf32>, i32 -> vector<32x128xf32>
    %81 = vector.broadcast %5 : vector<32x1xf32> to vector<32x128xf32>
    %82 = arith.mulf %80, %81 : vector<32x128xf32>
    %83 = vector.shape_cast %72 : vector<128xf32> to vector<1x128xf32>
    %84 = vector.broadcast %83 : vector<1x128xf32> to vector<32x128xf32>
    %85 = arith.mulf %79, %84 : vector<32x128xf32>
    %86 = vector.shape_cast %74 : vector<128xf32> to vector<1x128xf32>
    %87 = vector.broadcast %86 : vector<1x128xf32> to vector<32x128xf32>
    %88 = arith.mulf %68, %87 : vector<32x128xf32>
    %89 = arith.addf %85, %88 : vector<32x128xf32>
    %90 = vector.shape_cast %76 : vector<128xf32> to vector<1x128xf32>
    %91 = vector.broadcast %90 : vector<1x128xf32> to vector<32x128xf32>
    %92 = arith.mulf %82, %91 : vector<32x128xf32>
    %93 = arith.addf %89, %92 : vector<32x128xf32>
    %94 = vector.shape_cast %70 : vector<128xf32> to vector<1x128xf32>
    %95 = vector.broadcast %94 : vector<1x128xf32> to vector<32x128xf32>
    %96 = arith.addf %93, %95 : vector<32x128xf32>
    %cst_45 = arith.constant 5.000000e-01 : f32
    %97 = vector.broadcast %cst_45 : f32 to vector<32x128xf32>
    %98 = arith.mulf %97, %96 : vector<32x128xf32>
    %cst_46 = arith.constant 4.471500e-02 : f32
    %99 = vector.broadcast %cst_46 : f32 to vector<32x128xf32>
    %100 = arith.mulf %99, %96 : vector<32x128xf32>
    %101 = arith.mulf %100, %96 : vector<32x128xf32>
    %102 = arith.mulf %101, %96 : vector<32x128xf32>
    %103 = arith.addf %96, %102 : vector<32x128xf32>
    %cst_47 = arith.constant 0.797884583 : f32
    %104 = vector.broadcast %cst_47 : f32 to vector<32x128xf32>
    %105 = arith.mulf %104, %103 : vector<32x128xf32>
    %106 = math.tanh %105 : vector<32x128xf32>
    %cst_48 = arith.constant 1.000000e+00 : f32
    %107 = vector.broadcast %cst_48 : f32 to vector<32x128xf32>
    %108 = arith.addf %107, %106 : vector<32x128xf32>
    %109 = arith.mulf %98, %108 : vector<32x128xf32>
    %c0_49 = arith.constant 0 : index
    %c6 = arith.constant 6 : index
    %c0_50 = arith.constant 0 : index
    %110 = vector.load %arg6[%c0_49, %c6, %c0_50] : memref<1x17x128xf32, #tpu.memory_space<vmem>>, vector<1x1x128xf32>
    %111 = vector.shape_cast %110 : vector<1x1x128xf32> to vector<128xf32>
    %c0_51 = arith.constant 0 : index
    %c2_52 = arith.constant 2 : index
    %c0_53 = arith.constant 0 : index
    %c0_54 = arith.constant 0 : index
    %112 = vector.load %arg7[%c0_51, %c2_52, %c0_53, %c0_54] : memref<1x3x3x128xf32, #tpu.memory_space<vmem>>, vector<1x1x1x128xf32>
    %113 = vector.shape_cast %112 : vector<1x1x1x128xf32> to vector<128xf32>
    %c0_55 = arith.constant 0 : index
    %c2_56 = arith.constant 2 : index
    %c1_57 = arith.constant 1 : index
    %c0_58 = arith.constant 0 : index
    %114 = vector.load %arg7[%c0_55, %c2_56, %c1_57, %c0_58] : memref<1x3x3x128xf32, #tpu.memory_space<vmem>>, vector<1x1x1x128xf32>
    %115 = vector.shape_cast %114 : vector<1x1x1x128xf32> to vector<128xf32>
    %c0_59 = arith.constant 0 : index
    %c2_60 = arith.constant 2 : index
    %c2_61 = arith.constant 2 : index
    %c0_62 = arith.constant 0 : index
    %116 = vector.load %arg7[%c0_59, %c2_60, %c2_61, %c0_62] : memref<1x3x3x128xf32, #tpu.memory_space<vmem>>, vector<1x1x1x128xf32>
    %117 = vector.shape_cast %116 : vector<1x1x1x128xf32> to vector<128xf32>
    %c1_i32_63 = arith.constant 1 : i32
    %118 = tpu.dynamic_rotate %109 by %c1_i32_63 dim 0 : vector<32x128xf32>, i32 -> vector<32x128xf32>
    %119 = vector.broadcast %4 : vector<32x1xf32> to vector<32x128xf32>
    %120 = arith.mulf %118, %119 : vector<32x128xf32>
    %c31_i32_64 = arith.constant 31 : i32
    %121 = tpu.dynamic_rotate %109 by %c31_i32_64 dim 0 : vector<32x128xf32>, i32 -> vector<32x128xf32>
    %122 = vector.broadcast %5 : vector<32x1xf32> to vector<32x128xf32>
    %123 = arith.mulf %121, %122 : vector<32x128xf32>
    %124 = vector.shape_cast %113 : vector<128xf32> to vector<1x128xf32>
    %125 = vector.broadcast %124 : vector<1x128xf32> to vector<32x128xf32>
    %126 = arith.mulf %120, %125 : vector<32x128xf32>
    %127 = vector.shape_cast %115 : vector<128xf32> to vector<1x128xf32>
    %128 = vector.broadcast %127 : vector<1x128xf32> to vector<32x128xf32>
    %129 = arith.mulf %109, %128 : vector<32x128xf32>
    %130 = arith.addf %126, %129 : vector<32x128xf32>
    %131 = vector.shape_cast %117 : vector<128xf32> to vector<1x128xf32>
    %132 = vector.broadcast %131 : vector<1x128xf32> to vector<32x128xf32>
    %133 = arith.mulf %123, %132 : vector<32x128xf32>
    %134 = arith.addf %130, %133 : vector<32x128xf32>
    %135 = vector.shape_cast %111 : vector<128xf32> to vector<1x128xf32>
    %136 = vector.broadcast %135 : vector<1x128xf32> to vector<32x128xf32>
    %137 = arith.addf %134, %136 : vector<32x128xf32>
    %138 = arith.addf %40, %137 : vector<32x128xf32>
    %139 = arith.truncf %3 : vector<32x128xf32> to vector<32x128xbf16>
    %c0_65 = arith.constant 0 : index
    %c0_66 = arith.constant 0 : index
    %c0_67 = arith.constant 0 : index
    %140 = vector.load %arg5[%c0_65, %c0_66, %c0_67] : memref<1x128x896xbf16, #tpu.memory_space<vmem>>, vector<1x128x512xbf16>
    %141 = vector.shape_cast %140 : vector<1x128x512xbf16> to vector<128x512xbf16>
    %cst_68 = arith.constant dense<0.000000e+00> : vector<32x512xf32>
    %142 = tpu.matmul %139, %141, %cst_68 {dimension_numbers = #tpu.dot_dimension_numbers<[1], [0], [0], [1], [0, 0, 1, 1], [], []>} : vector<32x128xbf16>, vector<128x512xbf16>, vector<32x512xf32> -> vector<32x512xf32>
    %143 = vector.extract_strided_slice %142 {offsets = [0, 0], sizes = [32, 128], strides = [1, 1]} : vector<32x512xf32> to vector<32x128xf32>
    %c0_69 = arith.constant 0 : index
    %c1_70 = arith.constant 1 : index
    %c0_71 = arith.constant 0 : index
    %144 = vector.load %arg6[%c0_69, %c1_70, %c0_71] : memref<1x17x128xf32, #tpu.memory_space<vmem>>, vector<1x1x128xf32>
    %145 = vector.shape_cast %144 : vector<1x1x128xf32> to vector<128xf32>
    %146 = vector.shape_cast %145 : vector<128xf32> to vector<1x128xf32>
    %147 = vector.broadcast %146 : vector<1x128xf32> to vector<32x128xf32>
    %148 = arith.addf %143, %147 : vector<32x128xf32>
    %cst_72 = arith.constant 5.000000e-01 : f32
    %149 = vector.broadcast %cst_72 : f32 to vector<32x128xf32>
    %150 = arith.mulf %149, %148 : vector<32x128xf32>
    %cst_73 = arith.constant 4.471500e-02 : f32
    %151 = vector.broadcast %cst_73 : f32 to vector<32x128xf32>
    %152 = arith.mulf %151, %148 : vector<32x128xf32>
    %153 = arith.mulf %152, %148 : vector<32x128xf32>
    %154 = arith.mulf %153, %148 : vector<32x128xf32>
    %155 = arith.addf %148, %154 : vector<32x128xf32>
    %cst_74 = arith.constant 0.797884583 : f32
    %156 = vector.broadcast %cst_74 : f32 to vector<32x128xf32>
    %157 = arith.mulf %156, %155 : vector<32x128xf32>
    %158 = math.tanh %157 : vector<32x128xf32>
    %cst_75 = arith.constant 1.000000e+00 : f32
    %159 = vector.broadcast %cst_75 : f32 to vector<32x128xf32>
    %160 = arith.addf %159, %158 : vector<32x128xf32>
    %161 = arith.mulf %150, %160 : vector<32x128xf32>
    %162 = arith.truncf %161 : vector<32x128xf32> to vector<32x128xbf16>
    %c0_76 = arith.constant 0 : index
    %c0_77 = arith.constant 0 : index
    %c512 = arith.constant 512 : index
    %163 = vector.load %arg5[%c0_76, %c0_77, %c512] : memref<1x128x896xbf16, #tpu.memory_space<vmem>>, vector<1x128x128xbf16>
    %164 = vector.shape_cast %163 : vector<1x128x128xbf16> to vector<128x128xbf16>
    %cst_78 = arith.constant dense<0.000000e+00> : vector<32x128xf32>
    %165 = tpu.matmul %162, %164, %cst_78 {dimension_numbers = #tpu.dot_dimension_numbers<[1], [0], [0], [1], [0, 0, 1, 1], [], []>} : vector<32x128xbf16>, vector<128x128xbf16>, vector<32x128xf32> -> vector<32x128xf32>
    %166 = arith.addf %138, %165 : vector<32x128xf32>
    %c0_79 = arith.constant 0 : index
    %c2_80 = arith.constant 2 : index
    %c0_81 = arith.constant 0 : index
    %167 = vector.load %arg6[%c0_79, %c2_80, %c0_81] : memref<1x17x128xf32, #tpu.memory_space<vmem>>, vector<1x1x128xf32>
    %168 = vector.shape_cast %167 : vector<1x1x128xf32> to vector<128xf32>
    %169 = vector.shape_cast %168 : vector<128xf32> to vector<1x128xf32>
    %170 = vector.broadcast %169 : vector<1x128xf32> to vector<32x128xf32>
    %171 = arith.addf %166, %170 : vector<32x128xf32>
    %172 = vector.extract_strided_slice %142 {offsets = [0, 128], sizes = [32, 128], strides = [1, 1]} : vector<32x512xf32> to vector<32x128xf32>
    %c0_82 = arith.constant 0 : index
    %c7 = arith.constant 7 : index
    %c0_83 = arith.constant 0 : index
    %173 = vector.load %arg6[%c0_82, %c7, %c0_83] : memref<1x17x128xf32, #tpu.memory_space<vmem>>, vector<1x1x128xf32>
    %174 = vector.shape_cast %173 : vector<1x1x128xf32> to vector<128xf32>
    %175 = vector.shape_cast %174 : vector<128xf32> to vector<1x128xf32>
    %176 = vector.broadcast %175 : vector<1x128xf32> to vector<32x128xf32>
    %177 = arith.addf %172, %176 : vector<32x128xf32>
    %cst_84 = arith.constant 0.000000e+00 : f32
    %178 = vector.broadcast %cst_84 : f32 to vector<32x128xf32>
    %179 = arith.cmpf ogt, %177, %178 : vector<32x128xf32>
    %cst_85 = arith.constant 1.000000e+00 : f32
    %180 = vector.broadcast %cst_85 : f32 to vector<32x128xf32>
    %181 = arith.addf %177, %180 : vector<32x128xf32>
    %cst_86 = arith.constant 0.000000e+00 : f32
    %182 = vector.broadcast %cst_86 : f32 to vector<32x128xf32>
    %183 = arith.minimumf %177, %182 : vector<32x128xf32>
    %184 = math.exp %183 : vector<32x128xf32>
    %185 = arith.select %179, %181, %184 : vector<32x128xi1>, vector<32x128xf32>
    %186 = vector.shape_cast %185 : vector<32x128xf32> to vector<2x16x128xf32>
    %187 = vector.extract_strided_slice %142 {offsets = [0, 256], sizes = [32, 128], strides = [1, 1]} : vector<32x512xf32> to vector<32x128xf32>
    %c0_87 = arith.constant 0 : index
    %c8 = arith.constant 8 : index
    %c0_88 = arith.constant 0 : index
    %188 = vector.load %arg6[%c0_87, %c8, %c0_88] : memref<1x17x128xf32, #tpu.memory_space<vmem>>, vector<1x1x128xf32>
    %189 = vector.shape_cast %188 : vector<1x1x128xf32> to vector<128xf32>
    %190 = vector.shape_cast %189 : vector<128xf32> to vector<1x128xf32>
    %191 = vector.broadcast %190 : vector<1x128xf32> to vector<32x128xf32>
    %192 = arith.addf %187, %191 : vector<32x128xf32>
    %cst_89 = arith.constant 0.000000e+00 : f32
    %193 = vector.broadcast %cst_89 : f32 to vector<32x128xf32>
    %194 = arith.cmpf ogt, %192, %193 : vector<32x128xf32>
    %cst_90 = arith.constant 1.000000e+00 : f32
    %195 = vector.broadcast %cst_90 : f32 to vector<32x128xf32>
    %196 = arith.addf %192, %195 : vector<32x128xf32>
    %cst_91 = arith.constant 0.000000e+00 : f32
    %197 = vector.broadcast %cst_91 : f32 to vector<32x128xf32>
    %198 = arith.minimumf %192, %197 : vector<32x128xf32>
    %199 = math.exp %198 : vector<32x128xf32>
    %200 = arith.select %194, %196, %199 : vector<32x128xi1>, vector<32x128xf32>
    %201 = vector.shape_cast %200 : vector<32x128xf32> to vector<2x16x128xf32>
    %202 = vector.extract_strided_slice %142 {offsets = [0, 384], sizes = [32, 128], strides = [1, 1]} : vector<32x512xf32> to vector<32x128xf32>
    %c0_92 = arith.constant 0 : index
    %c9 = arith.constant 9 : index
    %c0_93 = arith.constant 0 : index
    %203 = vector.load %arg6[%c0_92, %c9, %c0_93] : memref<1x17x128xf32, #tpu.memory_space<vmem>>, vector<1x1x128xf32>
    %204 = vector.shape_cast %203 : vector<1x1x128xf32> to vector<128xf32>
    %205 = vector.shape_cast %204 : vector<128xf32> to vector<1x128xf32>
    %206 = vector.broadcast %205 : vector<1x128xf32> to vector<32x128xf32>
    %207 = arith.addf %202, %206 : vector<32x128xf32>
    %208 = vector.shape_cast %207 : vector<32x128xf32> to vector<2x16x128xf32>
    %cst_94 = arith.constant dense<0.000000e+00> : vector<2x128x128xf32>
    %209 = tpu.matmul %201, %208, %cst_94 {dimension_numbers = #tpu.dot_dimension_numbers<[1], [1], [2], [2], [0, 0, 0, 2, 1, 2], [0], [0]>} : vector<2x16x128xf32>, vector<2x16x128xf32>, vector<2x128x128xf32> -> vector<2x128x128xf32>
    %cst_95 = arith.constant dense<0.000000e+00> : vector<2x16x128xf32>
    %210 = tpu.matmul %186, %209, %cst_95 {dimension_numbers = #tpu.dot_dimension_numbers<[2], [1], [1], [2], [0, 0, 0, 1, 1, 2], [0], [0]>} : vector<2x16x128xf32>, vector<2x128x128xf32>, vector<2x16x128xf32> -> vector<2x16x128xf32>
    %cst_96 = arith.constant dense<0.000000e+00> : vector<2x128xf32>
    %211 = vector.multi_reduction <add>, %201, %cst_96 [1] : vector<2x16x128xf32> to vector<2x128xf32>
    %212 = vector.shape_cast %211 : vector<2x128xf32> to vector<2x1x128xf32>
    %213 = vector.broadcast %212 : vector<2x1x128xf32> to vector<2x16x128xf32>
    %214 = arith.mulf %186, %213 : vector<2x16x128xf32>
    %cst_97 = arith.constant dense<0.000000e+00> : vector<2x16xf32>
    %215 = vector.multi_reduction <add>, %214, %cst_97 [2] : vector<2x16x128xf32> to vector<2x16xf32>
    %216 = vector.shape_cast %215 : vector<2x16xf32> to vector<2x16x1xf32>
    %cst_98 = arith.constant 9.99999997E-7 : f32
    %217 = vector.broadcast %cst_98 : f32 to vector<2x16x1xf32>
    %218 = arith.addf %216, %217 : vector<2x16x1xf32>
    %219 = vector.broadcast %218 : vector<2x16x1xf32> to vector<2x16x128xf32>
    %220 = arith.divf %210, %219 : vector<2x16x128xf32>
    %221 = vector.shape_cast %220 : vector<2x16x128xf32> to vector<32x128xf32>
    %222 = arith.addf %171, %221 : vector<32x128xf32>
    %c0_99 = arith.constant 0 : index
    %c12 = arith.constant 12 : index
    %c0_100 = arith.constant 0 : index
    %223 = vector.load %arg6[%c0_99, %c12, %c0_100] : memref<1x17x128xf32, #tpu.memory_space<vmem>>, vector<1x1x128xf32>
    %224 = vector.shape_cast %223 : vector<1x1x128xf32> to vector<128xf32>
    %c0_101 = arith.constant 0 : index
    %c13 = arith.constant 13 : index
    %c0_102 = arith.constant 0 : index
    %225 = vector.load %arg6[%c0_101, %c13, %c0_102] : memref<1x17x128xf32, #tpu.memory_space<vmem>>, vector<1x1x128xf32>
    %226 = vector.shape_cast %225 : vector<1x1x128xf32> to vector<128xf32>
    %cst_103 = arith.constant dense<0.000000e+00> : vector<32xf32>
    %227 = vector.multi_reduction <add>, %222, %cst_103 [1] : vector<32x128xf32> to vector<32xf32>
    %228 = vector.shape_cast %227 : vector<32xf32> to vector<32x1xf32>
    %cst_104 = arith.constant 1.280000e+02 : f32
    %229 = vector.broadcast %cst_104 : f32 to vector<32x1xf32>
    %230 = arith.divf %228, %229 : vector<32x1xf32>
    %231 = vector.broadcast %230 : vector<32x1xf32> to vector<32x128xf32>
    %232 = arith.subf %222, %231 : vector<32x128xf32>
    %233 = arith.mulf %232, %232 : vector<32x128xf32>
    %cst_105 = arith.constant dense<0.000000e+00> : vector<32xf32>
    %234 = vector.multi_reduction <add>, %233, %cst_105 [1] : vector<32x128xf32> to vector<32xf32>
    %235 = vector.shape_cast %234 : vector<32xf32> to vector<32x1xf32>
    %cst_106 = arith.constant 1.280000e+02 : f32
    %236 = vector.broadcast %cst_106 : f32 to vector<32x1xf32>
    %237 = arith.divf %235, %236 : vector<32x1xf32>
    %238 = vector.broadcast %230 : vector<32x1xf32> to vector<32x128xf32>
    %239 = arith.subf %222, %238 : vector<32x128xf32>
    %cst_107 = arith.constant 9.99999974E-6 : f32
    %240 = vector.broadcast %cst_107 : f32 to vector<32x1xf32>
    %241 = arith.addf %237, %240 : vector<32x1xf32>
    %242 = math.rsqrt %241 : vector<32x1xf32>
    %243 = vector.broadcast %242 : vector<32x1xf32> to vector<32x128xf32>
    %244 = arith.mulf %239, %243 : vector<32x128xf32>
    %245 = vector.shape_cast %224 : vector<128xf32> to vector<1x128xf32>
    %246 = vector.broadcast %245 : vector<1x128xf32> to vector<32x128xf32>
    %247 = arith.mulf %244, %246 : vector<32x128xf32>
    %248 = vector.shape_cast %226 : vector<128xf32> to vector<1x128xf32>
    %249 = vector.broadcast %248 : vector<1x128xf32> to vector<32x128xf32>
    %250 = arith.addf %247, %249 : vector<32x128xf32>
    %251 = arith.truncf %250 : vector<32x128xf32> to vector<32x128xbf16>
    %c0_108 = arith.constant 0 : index
    %c0_109 = arith.constant 0 : index
    %c640 = arith.constant 640 : index
    %252 = vector.load %arg5[%c0_108, %c0_109, %c640] : memref<1x128x896xbf16, #tpu.memory_space<vmem>>, vector<1x128x128xbf16>
    %253 = vector.shape_cast %252 : vector<1x128x128xbf16> to vector<128x128xbf16>
    %cst_110 = arith.constant dense<0.000000e+00> : vector<32x128xf32>
    %254 = tpu.matmul %251, %253, %cst_110 {dimension_numbers = #tpu.dot_dimension_numbers<[1], [0], [0], [1], [0, 0, 1, 1], [], []>} : vector<32x128xbf16>, vector<128x128xbf16>, vector<32x128xf32> -> vector<32x128xf32>
    %c0_111 = arith.constant 0 : index
    %c10 = arith.constant 10 : index
    %c0_112 = arith.constant 0 : index
    %255 = vector.load %arg6[%c0_111, %c10, %c0_112] : memref<1x17x128xf32, #tpu.memory_space<vmem>>, vector<1x1x128xf32>
    %256 = vector.shape_cast %255 : vector<1x1x128xf32> to vector<128xf32>
    %257 = vector.shape_cast %256 : vector<128xf32> to vector<1x128xf32>
    %258 = vector.broadcast %257 : vector<1x128xf32> to vector<32x128xf32>
    %259 = arith.addf %254, %258 : vector<32x128xf32>
    %cst_113 = arith.constant 5.000000e-01 : f32
    %260 = vector.broadcast %cst_113 : f32 to vector<32x128xf32>
    %261 = arith.mulf %260, %259 : vector<32x128xf32>
    %cst_114 = arith.constant 4.471500e-02 : f32
    %262 = vector.broadcast %cst_114 : f32 to vector<32x128xf32>
    %263 = arith.mulf %262, %259 : vector<32x128xf32>
    %264 = arith.mulf %263, %259 : vector<32x128xf32>
    %265 = arith.mulf %264, %259 : vector<32x128xf32>
    %266 = arith.addf %259, %265 : vector<32x128xf32>
    %cst_115 = arith.constant 0.797884583 : f32
    %267 = vector.broadcast %cst_115 : f32 to vector<32x128xf32>
    %268 = arith.mulf %267, %266 : vector<32x128xf32>
    %269 = math.tanh %268 : vector<32x128xf32>
    %cst_116 = arith.constant 1.000000e+00 : f32
    %270 = vector.broadcast %cst_116 : f32 to vector<32x128xf32>
    %271 = arith.addf %270, %269 : vector<32x128xf32>
    %272 = arith.mulf %261, %271 : vector<32x128xf32>
    %273 = arith.truncf %272 : vector<32x128xf32> to vector<32x128xbf16>
    %c0_117 = arith.constant 0 : index
    %c0_118 = arith.constant 0 : index
    %c768 = arith.constant 768 : index
    %274 = vector.load %arg5[%c0_117, %c0_118, %c768] : memref<1x128x896xbf16, #tpu.memory_space<vmem>>, vector<1x128x128xbf16>
    %275 = vector.shape_cast %274 : vector<1x128x128xbf16> to vector<128x128xbf16>
    %cst_119 = arith.constant dense<0.000000e+00> : vector<32x128xf32>
    %276 = tpu.matmul %273, %275, %cst_119 {dimension_numbers = #tpu.dot_dimension_numbers<[1], [0], [0], [1], [0, 0, 1, 1], [], []>} : vector<32x128xbf16>, vector<128x128xbf16>, vector<32x128xf32> -> vector<32x128xf32>
    %277 = arith.addf %250, %276 : vector<32x128xf32>
    %c0_120 = arith.constant 0 : index
    %c11 = arith.constant 11 : index
    %c0_121 = arith.constant 0 : index
    %278 = vector.load %arg6[%c0_120, %c11, %c0_121] : memref<1x17x128xf32, #tpu.memory_space<vmem>>, vector<1x1x128xf32>
    %279 = vector.shape_cast %278 : vector<1x1x128xf32> to vector<128xf32>
    %280 = vector.shape_cast %279 : vector<128xf32> to vector<1x128xf32>
    %281 = vector.broadcast %280 : vector<1x128xf32> to vector<32x128xf32>
    %282 = arith.addf %277, %281 : vector<32x128xf32>
    %c0_122 = arith.constant 0 : index
    %c14 = arith.constant 14 : index
    %c0_123 = arith.constant 0 : index
    %283 = vector.load %arg6[%c0_122, %c14, %c0_123] : memref<1x17x128xf32, #tpu.memory_space<vmem>>, vector<1x1x128xf32>
    %284 = vector.shape_cast %283 : vector<1x1x128xf32> to vector<128xf32>
    %c0_124 = arith.constant 0 : index
    %c15 = arith.constant 15 : index
    %c0_125 = arith.constant 0 : index
    %285 = vector.load %arg6[%c0_124, %c15, %c0_125] : memref<1x17x128xf32, #tpu.memory_space<vmem>>, vector<1x1x128xf32>
    %286 = vector.shape_cast %285 : vector<1x1x128xf32> to vector<128xf32>
    %cst_126 = arith.constant dense<0.000000e+00> : vector<32xf32>
    %287 = vector.multi_reduction <add>, %282, %cst_126 [1] : vector<32x128xf32> to vector<32xf32>
    %288 = vector.shape_cast %287 : vector<32xf32> to vector<32x1xf32>
    %cst_127 = arith.constant 1.280000e+02 : f32
    %289 = vector.broadcast %cst_127 : f32 to vector<32x1xf32>
    %290 = arith.divf %288, %289 : vector<32x1xf32>
    %291 = vector.broadcast %290 : vector<32x1xf32> to vector<32x128xf32>
    %292 = arith.subf %282, %291 : vector<32x128xf32>
    %293 = arith.mulf %292, %292 : vector<32x128xf32>
    %cst_128 = arith.constant dense<0.000000e+00> : vector<32xf32>
    %294 = vector.multi_reduction <add>, %293, %cst_128 [1] : vector<32x128xf32> to vector<32xf32>
    %295 = vector.shape_cast %294 : vector<32xf32> to vector<32x1xf32>
    %cst_129 = arith.constant 1.280000e+02 : f32
    %296 = vector.broadcast %cst_129 : f32 to vector<32x1xf32>
    %297 = arith.divf %295, %296 : vector<32x1xf32>
    %298 = vector.broadcast %290 : vector<32x1xf32> to vector<32x128xf32>
    %299 = arith.subf %282, %298 : vector<32x128xf32>
    %cst_130 = arith.constant 9.99999974E-6 : f32
    %300 = vector.broadcast %cst_130 : f32 to vector<32x1xf32>
    %301 = arith.addf %297, %300 : vector<32x1xf32>
    %302 = math.rsqrt %301 : vector<32x1xf32>
    %303 = vector.broadcast %302 : vector<32x1xf32> to vector<32x128xf32>
    %304 = arith.mulf %299, %303 : vector<32x128xf32>
    %305 = vector.shape_cast %284 : vector<128xf32> to vector<1x128xf32>
    %306 = vector.broadcast %305 : vector<1x128xf32> to vector<32x128xf32>
    %307 = arith.mulf %304, %306 : vector<32x128xf32>
    %308 = vector.shape_cast %286 : vector<128xf32> to vector<1x128xf32>
    %309 = vector.broadcast %308 : vector<1x128xf32> to vector<32x128xf32>
    %310 = arith.addf %307, %309 : vector<32x128xf32>
    %c0_131 = arith.constant 0 : index
    %c0_132 = arith.constant 0 : index
    %311 = vector.load %arg11[%c0_131, %c0_132] : memref<32x128xf32, #tpu.memory_space<vmem>>, vector<32x128xf32>
    tpu.vector_store %arg11[%c0_131, %c0_132], %310 {strides = array<i32>} : memref<32x128xf32, #tpu.memory_space<vmem>>, vector<32x128xf32>,
    %c1_i32_133 = arith.constant 1 : i32
    %312 = arith.cmpi eq, %arg1, %c1_i32_133 : i32
    %313 = arith.extui %312 : i1 to i32
    %c0_i32_134 = arith.constant 0 : i32
    %314 = arith.cmpi ne, %313, %c0_i32_134 : i32
    scf.if %314 {
      %315 = vector.shape_cast %310 : vector<32x128xf32> to vector<2x16x128xf32>
      %cst_135 = arith.constant dense<0.000000e+00> : vector<2x128xf32>
      %316 = vector.multi_reduction <add>, %315, %cst_135 [1] : vector<2x16x128xf32> to vector<2x128xf32>
      %cst_136 = arith.constant 1.600000e+01 : f32
      %317 = vector.broadcast %cst_136 : f32 to vector<2x128xf32>
      %318 = arith.divf %316, %317 : vector<2x128xf32>
      %319 = arith.truncf %318 : vector<2x128xf32> to vector<2x128xbf16>
      %c0_137 = arith.constant 0 : index
      %c0_138 = arith.constant 0 : index
      %320 = vector.load %arg8[%c0_137, %c0_138] : memref<128x128xbf16, #tpu.memory_space<vmem>>, vector<128x128xbf16>
      %cst_139 = arith.constant dense<0.000000e+00> : vector<2x128xf32>
      %321 = tpu.matmul %319, %320, %cst_139 {dimension_numbers = #tpu.dot_dimension_numbers<[1], [0], [0], [1], [0, 0, 1, 1], [], []>} : vector<2x128xbf16>, vector<128x128xbf16>, vector<2x128xf32> -> vector<2x128xf32>
      %c0_140 = arith.constant 0 : index
      %c0_141 = arith.constant 0 : index
      %322 = vector.load %arg9[%c0_140, %c0_141] : memref<1x128xf32, #tpu.memory_space<vmem>>, vector<1x128xf32>
      %323 = vector.broadcast %322 : vector<1x128xf32> to vector<2x128xf32>
      %324 = arith.addf %321, %323 : vector<2x128xf32>
      %c0_142 = arith.constant 0 : index
      %c0_143 = arith.constant 0 : index
      %325 = vector.load %arg10[%c0_142, %c0_143] : memref<2x128xf32, #tpu.memory_space<vmem>>, vector<2x128xf32>
      tpu.vector_store %arg10[%c0_142, %c0_143], %324 {strides = array<i32>} : memref<2x128xf32, #tpu.memory_space<vmem>>, vector<2x128xf32>,
    } else {
    }
    return
  }
  func.func @transform_0(%arg0: i32, %arg1: i32) -> (i32, i32) {
    %c0_i32 = arith.constant 0 : i32
    %c0_i32_0 = arith.constant 0 : i32
    return %arg0, %c0_i32 : i32, i32
  }
  func.func @transform_1(%arg0: i32, %arg1: i32) -> (i32, i32) {
    %c0_i32 = arith.constant 0 : i32
    %c0_i32_0 = arith.constant 0 : i32
    %c0_i32_1 = arith.constant 0 : i32
    return %c0_i32, %c0_i32_0 : i32, i32
  }
  func.func @transform_2(%arg0: i32, %arg1: i32) -> (i32, i32) {
    %c0_i32 = arith.constant 0 : i32
    %c0_i32_0 = arith.constant 0 : i32
    return %arg0, %c0_i32 : i32, i32
  }
  func.func @transform_3(%arg0: i32, %arg1: i32) -> (i32, i32, i32) {
    %c0_i32 = arith.constant 0 : i32
    %c0_i32_0 = arith.constant 0 : i32
    %c0_i32_1 = arith.constant 0 : i32
    return %arg1, %c0_i32, %c0_i32_0 : i32, i32, i32
  }
  func.func @transform_4(%arg0: i32, %arg1: i32) -> (i32, i32, i32) {
    %c0_i32 = arith.constant 0 : i32
    %c0_i32_0 = arith.constant 0 : i32
    %c0_i32_1 = arith.constant 0 : i32
    return %arg1, %c0_i32, %c0_i32_0 : i32, i32, i32
  }
  func.func @transform_5(%arg0: i32, %arg1: i32) -> (i32, i32, i32, i32) {
    %c0_i32 = arith.constant 0 : i32
    %c0_i32_0 = arith.constant 0 : i32
    %c0_i32_1 = arith.constant 0 : i32
    %c0_i32_2 = arith.constant 0 : i32
    return %arg1, %c0_i32, %c0_i32_0, %c0_i32_1 : i32, i32, i32, i32
  }
  func.func @transform_6(%arg0: i32, %arg1: i32) -> (i32, i32) {
    %c0_i32 = arith.constant 0 : i32
    %c0_i32_0 = arith.constant 0 : i32
    %c0_i32_1 = arith.constant 0 : i32
    return %c0_i32, %c0_i32_0 : i32, i32
  }
  func.func @transform_7(%arg0: i32, %arg1: i32) -> (i32, i32) {
    %c0_i32 = arith.constant 0 : i32
    %c0_i32_0 = arith.constant 0 : i32
    %c0_i32_1 = arith.constant 0 : i32
    return %c0_i32, %c0_i32_0 : i32, i32
  }
  func.func @transform_8(%arg0: i32, %arg1: i32) -> (i32, i32) {
    %c0_i32 = arith.constant 0 : i32
    %c0_i32_0 = arith.constant 0 : i32
    return %arg0, %c0_i32 : i32, i32
  }
}

</mosaic_0001>

<bundles_post_ra>
// kernel: tpu_custom_call.1
= control target key start
LH: loop header
LB: loop body
LE: loop exit
PB: predicated region body
PF: predicated region fallthrough
CT: control target
= control target key end

     0   :  { %s4551_s0 = inlined_call_operand.hbm [shape: bf16[32,128], index: 0, kind: input, shape index: {}]   ;;  %s4552_s1 = inlined_call_operand.vmem [shape: bf16[128,128], index: 1, kind: input, shape index: {}]   ;;  %s4553_s2 = inlined_call_operand.hbm [shape: f32[32,128], index: 2, kind: input, shape index: {}]   ;;  %s4554_s3 = inlined_call_operand.hbm [shape: bf16[2,128,896], index: 3, kind: input, shape index: {}]   ;;  %s4555_s4 = inlined_call_operand.vmem [shape: f32[2,17,128], index: 4, kind: input, shape index: {}]   ;;  %s4556_s5 = inlined_call_operand.vmem [shape: f32[2,3,3,128], index: 5, kind: input, shape index: {}]   ;;  %s4557_s6 = inlined_call_operand.vmem [shape: bf16[128,128], index: 6, kind: input, shape index: {}]   ;;  %s4558_s7 = inlined_call_operand.vmem [shape: f32[1,128], index: 7, kind: input, shape index: {}]   ;;  %s4559_s8 = inlined_call_operand.hbm [shape: f32[2,128], index: 8, kind: output, shape index: {}]  }
   0x1   :  { %4562 = sst [smem:[#allocation16_spill]] %s4551_s0 }
   0x2   :  { %4563 = sst [smem:[#allocation17_spill]] %s4558_s7 }
   0x3   :  { %4564 = sst [smem:[#allocation18_spill]] %s4559_s8 }
   0x4   :  { %13 = vsyncpa [#allocation6], 0 }
   0x5   :  { %14 = vsyncpa [#allocation9], 0 }
   0x6   :  { %15 = vsyncpa [#allocation7], 0  ;;  %s3878_s27 = smov 0   ;;  %s3880_s28 = smov 0  }
   0x7   :  { %s3882_s29 = smov 0   ;;  %s3884_s30 = smov 0  }
   0x8   :  { %s3886_s9 = smov 0   ;;  %s3888_s10 = smov 0  }
   0x9 LB: > { %s3907_s11 = sadd.s32 4294967295, %s3816_s10   ;;  %p120_p0 = scmp.ne.s32.totalorder %s3804_s29, %s3800_s28  ;;  %s3816_s10 = sphi %s3888_s10, %s21_s10   ;;  %s3812_s9 = sphi %s3886_s9, %s4583_s9   ;;  %s3808_s30 = sphi %s3884_s30, %s4582_s30   ;;  %s3804_s29 = sphi %s3882_s29, %s4581_s29   ;;  %s3800_s28 = sphi %s3880_s28, %s4580_s28   ;;  %s3796_s27 = sphi %s3878_s27, %s4579_s27  }
   0xa   : > { %p121_p1 = scmp.eq.s32.totalorder %s3816_s10, 0  ;;  %p126_p2 = scmp.ne.s32.totalorder %s3800_s28, %s3796_s27 }
   0xb   : > { %p4560_p3 = scmp.eq.s32.totalorder %s3907_s11, 0  ;;  %p2880_p5 = scmp.ge.s32.totalorder %s3816_s10, 1 }
   0xc   : > { %p122_p4 = por %p121_p1, %p120_p0  ;;  %p257_p7 = scmp.lt.s32.totalorder %s3816_s10, 3 }
   0xd   : > { %p3918_p6 = por %p4560_p3, %p126_p2  ;;  %s3818_s15 = smov [#allocation5]  }
   0xe   : > { %p3923_p8 = pnand %p2880_p5, %p257_p7  ;;  %s272_s16 = sshll.u32 %s3818_s15, 4  ;;  %s273_s16 = int_to_ptr.vmem [resolvable:$true] %s272_s16 }
   0xf   : > { %s4565_s13 = scalar_select %p3918_p6, 1, 0 }
  0x10   : > { %p3401_p9 = pneg %p3923_p8  ;;  %p3414_p10 = scmp.lt.s32.totalorder %s3816_s10, 2 }
  0x11   : > { %s3819_s19 = smov [#allocation8]   ;;  %s3661_s21 = scalar_lea.vmem %s273_s16, 256 }
  0x12   : > { %p3932_p11 = pnand %p3401_p9, %p4560_p3  ;;  %p3936_p12 = pnand %p3414_p10, %p122_p4 }
  0x13   : > { %s291_s20 = sshll.u32 %s3819_s19, 4  ;;  %p3662_p0 = scmp.ne.s32.totalorder %s273_s16, %s3661_s21  ;;  %s292_s20 = int_to_ptr.vmem [resolvable:$true] %s291_s20 }
  0x14   : > { %p3652_p13 = pneg %p3932_p11  ;;  %p3669_p5 = scmp.lt.s32.totalorder %s273_s16, %s273_s16 }
  0x15   : > { %p3670_p7 = scmp.lt.s32.totalorder %s3661_s21, %s3661_s21 }
  0x16   : > { %p3664_p1 = pnand %p3662_p0, %p3652_p13 }
  0x17   : > { %p3671_p9 = por %p3670_p7, %p3669_p5 }
  0x18   : > { %p3665_p2 = pneg %p3664_p1 }
  0x1a   : > { %p3672_p3 = pnand %p3671_p9, %p3665_p2 }
  0x1c   : > { %3675 = shalt.err (!%p3672_p3)
}
  0x1d   : > { %s3820_s22 = smov 64   ;;  %s3821_s23 = smov 4  }
  0x1e   : > { %s4569_s0 = sld [smem:[#allocation16_spill]]  ;;  %s3687_s26 = scalar_lea.vmem %s292_s20, 512 }
  0x1f   : > { %p3688_p4 = scmp.ne.s32.totalorder %s292_s20, %s3687_s26  ;;  %p3695_p1 = scmp.lt.s32.totalorder %s292_s20, %s292_s20 }
  0x20   : > { %p3696_p6 = scmp.lt.s32.totalorder %s3687_s26, %s3687_s26 }
  0x21   : > { %p3690_p10 = pnand %p3688_p4, %p3652_p13 }
  0x22   : > { %p3697_p5 = por %p3696_p6, %p3695_p1 }
  0x23   : > { %p3691_p0 = pneg %p3690_p10 }
  0x24   : > { %3404 = dma.hbm_to_vmem [thread:$0]  (!%p3932_p11), %s4569_s0, 256, %s273_s16, [#allocation6], %s3820_s22, %s3820_s22, %s3821_s23  }
  0x25   : > { %p3698_p2 = pnand %p3697_p5, %p3691_p0 }
  0x27   : > { %3701 = shalt.err (!%p3698_p2)
}
  0x28   : > { %s3822_s27 = smov 128   ;;  %s3823_s15 = smov 8  }
  0x29   : > { %3407 = dma.hbm_to_vmem [thread:$0]  (!%p3932_p11), %s4553_s2, 512, %s292_s20, [#allocation9], %s3822_s27, %s3822_s27, %s3823_s15  }
  0x2a   : > { %s311_s21 = sand.u32 1, %s3816_s10   ;;  %s30_s22 = sadd.s32 1, %s3812_s9 }
  0x2b   : > { %p31_p3 = scmp.ge.s32.totalorder %s30_s22, 2  ;;  %s313_s23 = sand.u32 1, %s3804_s29  }
  0x2c   : > { %s3382_s24 = smul.u32 448, %s313_s23  ;;  %s4570_s20 = sadd.s32 1, %s3804_s29 }
  0x2d   : > { %s4585_s22 = smov (%p31_p3, %s30_s22), 0  ;;  %s3383_s25 = smul.u32 7168, %s3812_s9 }
  0x2e   : > { %s110_s26 = ssub.s32 %s3812_s9, %s4585_s22  ;;  %s315_s12 = scalar_lea.vmem [#allocation10], %s3382_s24 }
  0x2f   : > { %s322_s0 = sshll.u32 %s315_s12, 4  ;;  %p111_p6 = scmp.eq.s32.totalorder %s110_s26, 0  ;;  %s323_s0 = int_to_ptr.vmem [resolvable:$true] %s322_s0 }
  0x30   : > { %s321_s7 = scalar_lea.hbm %s4554_s3, %s3383_s25  ;;  %s312_s15 = scalar_lea.sflag [#allocation6], %s311_s21 }
  0x31   : > { %s3972_s27 = scalar_select %p111_p6, %s3804_s29, %s4570_s20  }
  0x32   : > { %p3704_p11 = pneg %p3936_p12  ;;  %s3715_s16 = scalar_lea.vmem %s323_s0, 7168 }
  0x33   : > { %p3716_p13 = scmp.ne.s32.totalorder %s323_s0, %s3715_s16  ;;  %s3824_s19 = smov [#allocation10]  }
  0x34   : > { %s3720_s23 = sshll.u32 %s3824_s19, 4  ;;  %s3721_s23 = int_to_ptr.vmem [resolvable:$false] %s3720_s23 }
  0x35   : > { %p3718_p7 = pnand %p3716_p13, %p3704_p11  ;;  %s3722_s12 = scalar_lea.vmem %s3721_s23, 14336 }
  0x36   : > { %p3723_p4 = scmp.lt.s32.totalorder %s323_s0, %s3721_s23  ;;  %p3724_p10 = scmp.lt.s32.totalorder %s3722_s12, %s3715_s16 }
  0x37   : > { %p3719_p9 = pneg %p3718_p7 }
  0x38   : > { %p3725_p0 = por %p3724_p10, %p3723_p4 }
  0x3a   : > { %p3726_p1 = pnand %p3725_p0, %p3719_p9 }
  0x3c   : > { %3729 = shalt.err (!%p3726_p1)
}
  0x3d   : > { %s3825_s8 = smov 448   ;;  %s3826_s24 = smov 28  }
  0x3e   : > { %3411 = dma.hbm_to_vmem [thread:$0]  (!%p3936_p12), %s321_s7, 7168, %s323_s0, %s312_s15, %s3825_s8, %s3825_s8, %s3826_s24  }
  0x3f   : > { %350 = sbr.rel (%p3923_p8) target bundleno = 2494 (0x9be), region = 52  ;;  %p4571_p5 = scmp.eq.s32.totalorder (!%p3923_p8), %s3907_s11, 0 }
  0x44   : > { %3779 = dma.done.wait (%p4571_p5), [#allocation6], 256   ;;  %p4572_p2 = pmov %p4571_p5 }
  0x46   : > { %3781 = vsyncadd (%p4572_p2), [#allocation6], 4294967040  ;;  %p4573_p3 = pmov %p4572_p2 }
  0x47   : > { %p4574_p6 = pmov %p4572_p2 }
  0x48   : > { %3783 = dma.done.wait (%p4573_p3), [#allocation9], 512  }
  0x49   : > { %3785 = vsyncadd (%p4574_p6), [#allocation9], 4294966784  ;;  %s360_s18 = sand.u32 1, %s3907_s11   ;;  %s362_s0 = sand.u32 1, %s3800_s28  }
  0x4a   : > { %s3384_s7 = smul.u32 448, %s362_s0  ;;  %s361_s14 = scalar_lea.sflag [#allocation6], %s360_s18 }
  0x4b   : > { %p4575_p8 = scmp.ne.s32.totalorder %s4565_s13, 0 }
  0x4c   : > { %s3990_s21 = scalar_lea.vmem [#allocation10], %s3384_s7 }
  0x4d   : > { %3787 = dma.done.wait (%p4575_p8), %s361_s14, 7168  }
  0x4e   : > { %3789 = vsyncadd (%p4575_p8), %s361_s14, 4294960128  ;;  %p404_p12 = scmp.lt.s32.totalorder %s3808_s30, 1  ;;  %p2890_p11 = scmp.ne.s32.totalorder %s3808_s30, 0 }
  0x50   : > { %s405_s25 = scalar_select %p404_p12, %s3808_s30, 1 }
  0x51   : > { %418 = sbr.rel (%p2890_p11) target bundleno = 321 (0x141), region = 68 }
  0x52   : > { %s3385_s26 = smul.u32 24, %s405_s25 }
  0x53   : > { %s3386_s17 = smul.u32 12, %s405_s25 }
  0x54   : > { %s4001_s16 = scalar_lea.vmem %s4555_s4, %s3385_s26 }
  0x55   : > { %s4006_s12 = scalar_lea.vmem %s4556_s5, %s3386_s17 }
  0x56   : > { %v3482_v0 = vld [vmem:[%s4552_s1 + $0x38] sm:$0xff]   ;;  %v3483_v1 = vld [vmem:[%s4552_s1 + $0x30] sm:$0xff]   ;;  %v3484_v2 = vld [vmem:[%s4552_s1 + $0x28] sm:$0xff]   ;;  %v556_v10 = vlaneseq  ;;  %v3827_v19 = vmov 0.0   ;;  %vm617_vm3 = vcmask 7168   ;;  %v3828_v22 = vmov 1.0  }
  0x57   : > { %3156 = vmatprep.subr.bf16.mxu0 %v3482_v0  ;;  %v3485_v3 = vld [vmem:[%s4552_s1 + $0x20] sm:$0xff]   ;;  %v3486_v5 = vld [vmem:[%s4552_s1 + $0x18] sm:$0xff]   ;;  %v3487_v6 = vld [vmem:[%s4552_s1 + $0x10] sm:$0xff]   ;;  %619 = vst.msk [vmem:[#allocation3 + $0x8] sm:$0xff] %vm617_vm3, %v3828_v22 }
  0x58   : > { %3157 = vmatpush3.bf16.msra.mxu0 %v3482_v0  ;;  %v3490_v4 = vld [vmem:[#allocation5] sm:$0xff]   ;;  %v3488_v7 = vld [vmem:[%s4552_s1 + $0x8] sm:$0xff]   ;;  %v557_v11 = vshrl.u32 %v556_v10, 7  ;;  %621 = vst.msk [vmem:[#allocation3 + $0x18] sm:$0xff] %vm617_vm3, %v3828_v22  ;;  %630 = vst.msk [vmem:[#allocation4] sm:$0xff] %vm617_vm3, %v3828_v22 }
  0x59   : > { %3158 = vmatprep.subr.bf16.mxu0 %v3483_v1  ;;  %3172 = vmatprep.mubr.bf16.mxu0 %v3490_v4  ;;  %v3489_v8 = vld [vmem:[%s4552_s1] sm:$0xff]   ;;  %v3491_v9 = vld [vmem:[#allocation5 + $0x8] sm:$0xff]   ;;  %632 = vst.msk [vmem:[#allocation4 + $0x10] sm:$0xff] %vm617_vm3, %v3828_v22  ;;  %v439_v27 = vld [vmem:[#allocation8] sm:$0xff] }
  0x5a   : > { %v558_v12 = vadd.s32 8, %v557_v11  ;;  %v559_v13 = vadd.s32 16, %v557_v11  ;;  %v560_v14 = vadd.s32 24, %v557_v11  ;;  %v565_v15 = vand.u32 15, %v557_v11  ;;  %v441_v25 = vld [vmem:[#allocation8 + $0x10] sm:$0xff]  ;;  %v442_v30 = vld [vmem:[#allocation8 + $0x18] sm:$0xff] }
  0x5b   : > { %v440_v33 = vld [vmem:[#allocation8 + $0x8] sm:$0xff] }
  0x5c   : > { %3159 = vmatpush3.bf16.msra.mxu0 %v3483_v1  ;;  %v572_v16 = vand.u32 15, %v558_v12  ;;  %v579_v17 = vand.u32 15, %v559_v13  ;;  %v586_v18 = vand.u32 15, %v560_v14  ;;  %vm609_vm0 = vcmp.ne.s32.totalorder %v565_v15, 0 }
  0x5d   : > { %3160 = vmatprep.subr.bf16.mxu0 %v3484_v2  ;;  %v613_v20 = vsel %vm609_vm0, 1.0, %v3827_v19 }
  0x5e   : > { %vm611_vm1 = vcmp.ne.s32.totalorder %v579_v17, 0  ;;  %vm623_vm2 = vcmp.ne.s32.totalorder %v572_v16, 15  ;;  %618 = vst.msk [vmem:[#allocation3] sm:$0xff] %vm617_vm3, %v613_v20  ;;  %vm625_vm4 = vcmp.ne.s32.totalorder %v586_v18, 15 }
  0x5f   : > { %v615_v21 = vsel %vm611_vm1, 1.0, %v3827_v19  ;;  %v627_v23 = vsel %vm623_vm2, 1.0, %v3827_v19  ;;  %v629_v24 = vsel %vm625_vm4, 1.0, %v3827_v19 }
  0x60   : > { %3161 = vmatpush3.bf16.msra.mxu0 %v3484_v2  ;;  %620 = vst.msk [vmem:[#allocation3 + $0x10] sm:$0xff] %vm617_vm3, %v615_v21  ;;  %631 = vst.msk [vmem:[#allocation4 + $0x8] sm:$0xff] %vm617_vm3, %v627_v23 }
  0x61   : > { %3162 = vmatprep.subr.bf16.mxu0 %v3485_v3  ;;  %633 = vst.msk [vmem:[#allocation4 + $0x18] sm:$0xff] %vm617_vm3, %v629_v24 }
  0x64   : > { %3163 = vmatpush3.bf16.msra.mxu0 %v3485_v3 }
  0x65   : > { %3164 = vmatprep.subr.bf16.mxu0 %v3486_v5 }
  0x68   : > { %3165 = vmatpush3.bf16.msra.mxu0 %v3486_v5 }
  0x69   : > { %3166 = vmatprep.subr.bf16.mxu0 %v3487_v6 }
  0x6c   : > { %3167 = vmatpush3.bf16.msra.mxu0 %v3487_v6 }
  0x6d   : > { %3168 = vmatprep.subr.bf16.mxu0 %v3488_v7 }
  0x70   : > { %3169 = vmatpush3.bf16.msra.mxu0 %v3488_v7 }
  0x71   : > { %3170 = vmatprep.subr.bf16.mxu0 %v3489_v8 }
  0x74   : > { %3171 = vmatpush3.bf16.msra.mxu0 %v3489_v8 }
  0x77   : > { %3173 = vmatmul.mubr.bf16.vlgmr.msra.gmra.mxu0 %v3491_v9 }
 0x137   : > { %v3174_v26 = vpop.f32.mrf.mxu0 }
 0x138   : > { %v546_v28 = vadd.f32 %v3174_v26, %v441_v25 }
 0x139   : > { %v537_v29 = vpop.f32.mrf.mxu0 }
 0x13a   : > { %554 = vst [vmem:[#allocation2 + $0x18] sm:$0xff] %v546_v28  ;;  %v538_v31 = vadd.f32 %v537_v29, %v439_v27 }
 0x13b   : > { %v3175_v32 = vpop.f32.mrf.mxu0 }
 0x13c   : > { %552 = vst [vmem:[#allocation2 + $0x10] sm:$0xff] %v538_v31  ;;  %v549_v34 = vadd.f32 %v3175_v32, %v442_v30 }
 0x13d   : > { %v540_v35 = vpop.f32.mrf.mxu0 }
 0x13e   : > { %555 = vst [vmem:[#allocation2 + $0x8] sm:$0xff] %v549_v34  ;;  %v541_v36 = vadd.f32 %v540_v35, %v440_v33 }
 0x140   : > { %553 = vst [vmem:[#allocation2] sm:$0xff] %v541_v36 }
 0x141 PF: > { %v3494_v37 = vld [vmem:[%s3990_s21 + $0x18c] ss:$28 sps:$4 sm:$0xff]   ;;  %v3496_v38 = vld [vmem:[%s3990_s21 + $0x194] ss:$28 sps:$4 sm:$0xff]   ;;  %v3829_v39 = vmov 0   ;;  %vm1596_vm9 = vcmask 130048  }
 0x142   : > { %1242 = vmatprep.mubr.bf16.mxu0 %v3829_v39  ;;  %1295 = vmatprep.mubr.bf16.mxu1 %v3829_v39  ;;  %v3498_v40 = vld [vmem:[%s3990_s21 + $0x188] ss:$28 sps:$4 sm:$0xff]   ;;  %v3499_v41 = vld [vmem:[%s3990_s21 + $0x190] ss:$28 sps:$4 sm:$0xff]   ;;  %v3502_v43 = vld [vmem:[%s3990_s21 + $0x15c] ss:$28 sps:$4 sm:$0xff]  }
 0x143   : > { %1210 = vmatprep.subr.bf16.mxu0 %v3494_v37  ;;  %1263 = vmatprep.subr.bf16.mxu1 %v3496_v38  ;;  %v3500_v42 = vld [vmem:[%s3990_s21 + $0x154] ss:$28 sps:$4 sm:$0xff]   ;;  %v3506_v46 = vld [vmem:[%s3990_s21 + $0x11c] ss:$28 sps:$4 sm:$0xff]   ;;  %v3508_v47 = vld [vmem:[%s3990_s21 + $0x124] ss:$28 sps:$4 sm:$0xff]  }
 0x144   : > { %1211 = vmatpush1.bf16.msra.mxu0 %v3498_v40  ;;  %1264 = vmatpush1.bf16.msra.mxu1 %v3499_v41  ;;  %v3504_v44 = vld [vmem:[%s3990_s21 + $0x150] ss:$28 sps:$4 sm:$0xff]   ;;  %v3505_v45 = vld [vmem:[%s3990_s21 + $0x158] ss:$28 sps:$4 sm:$0xff]   ;;  %v3511_v49 = vld [vmem:[%s3990_s21 + $0x120] ss:$28 sps:$4 sm:$0xff]  }
 0x145   : > { %1212 = vmatprep.subr.bf16.mxu0 %v3500_v42  ;;  %1265 = vmatprep.subr.bf16.mxu1 %v3502_v43  ;;  %v3510_v48 = vld [vmem:[%s3990_s21 + $0x118] ss:$28 sps:$4 sm:$0xff]   ;;  %v3512_v50 = vld [vmem:[%s3990_s21 + $0xe4] ss:$28 sps:$4 sm:$0xff]   ;;  %v3514_v51 = vld [vmem:[%s3990_s21 + $0xec] ss:$28 sps:$4 sm:$0xff]  }
 0x146   : > { %v3516_v52 = vld [vmem:[%s3990_s21 + $0xe0] ss:$28 sps:$4 sm:$0xff]   ;;  %v3517_v53 = vld [vmem:[%s3990_s21 + $0xe8] ss:$28 sps:$4 sm:$0xff]   ;;  %v3520_v55 = vld [vmem:[%s3990_s21 + $0xb4] ss:$28 sps:$4 sm:$0xff]  }
 0x147   : > { %v3518_v54 = vld [vmem:[%s3990_s21 + $0xac] ss:$28 sps:$4 sm:$0xff]   ;;  %v3524_v58 = vld [vmem:[%s3990_s21 + $0x74] ss:$28 sps:$4 sm:$0xff]   ;;  %v3526_v59 = vld [vmem:[%s3990_s21 + $0x7c] ss:$28 sps:$4 sm:$0xff]  }
 0x148   : > { %1213 = vmatpush1.bf16.msra.mxu0 %v3504_v44  ;;  %1266 = vmatpush1.bf16.msra.mxu1 %v3505_v45  ;;  %v3522_v56 = vld [vmem:[%s3990_s21 + $0xa8] ss:$28 sps:$4 sm:$0xff]   ;;  %v3523_v57 = vld [vmem:[%s3990_s21 + $0xb0] ss:$28 sps:$4 sm:$0xff]   ;;  %v3529_v61 = vld [vmem:[%s3990_s21 + $0x78] ss:$28 sps:$4 sm:$0xff]  }
 0x149   : > { %1214 = vmatprep.subr.bf16.mxu0 %v3506_v46  ;;  %1267 = vmatprep.subr.bf16.mxu1 %v3508_v47  ;;  %v3528_v60 = vld [vmem:[%s3990_s21 + $0x70] ss:$28 sps:$4 sm:$0xff]   ;;  %v3530_v62 = vld [vmem:[%s3990_s21 + $0x3c] ss:$28 sps:$4 sm:$0xff]   ;;  %v3532_v63 = vld [vmem:[%s3990_s21 + $0x44] ss:$28 sps:$4 sm:$0xff]  }
 0x14a   : > { %v3534_v0 = vld [vmem:[%s3990_s21 + $0x38] ss:$28 sps:$4 sm:$0xff]   ;;  %v3535_v1 = vld [vmem:[%s3990_s21 + $0x40] ss:$28 sps:$4 sm:$0xff]   ;;  %v3538_v3 = vld [vmem:[%s3990_s21 + $0xc] ss:$28 sps:$4 sm:$0xff]  }
 0x14b   : > { %v3536_v2 = vld [vmem:[%s3990_s21 + $0x4] ss:$28 sps:$4 sm:$0xff]   ;;  %v4069_v7 = vld [vmem:[#allocation2] sm:$0xff]  ;;  %v4075_v11 = vld [vmem:[#allocation2 + $0x18] sm:$0xff]  ;;  %p3021_p13 = scmp.ne.s32.totalorder %s3808_s30, 1 }
 0x14c   : > { %1215 = vmatpush1.bf16.msra.mxu0 %v3510_v48  ;;  %1268 = vmatpush1.bf16.msra.mxu1 %v3511_v49  ;;  %v3540_v4 = vld [vmem:[%s3990_s21] ss:$28 sps:$4 sm:$0xff]   ;;  %v3541_v5 = vld [vmem:[%s3990_s21 + $0x8] ss:$28 sps:$4 sm:$0xff]   ;;  %v3542_v8 = vld [vmem:[%s3990_s21 + $0x198] ss:$28 sps:$4 sm:$0xff]  }
 0x14d   : > { %1216 = vmatprep.subr.bf16.mxu0 %v3512_v50  ;;  %1269 = vmatprep.subr.bf16.mxu1 %v3514_v51  ;;  %v4067_v6 = vld [vmem:[#allocation2 + $0x10] sm:$0xff]  ;;  %v4077_v12 = vld [vmem:[#allocation2 + $0x8] sm:$0xff]  ;;  %v3545_v15 = vld [vmem:[%s3990_s21 + $0xf0] ss:$28 sps:$4 sm:$0xff]  }
 0x14e   : > { %v1016_v9 = vpack.c.bf16 %v4069_v7, %v4067_v6  ;;  %v3543_v10 = vld [vmem:[%s3990_s21 + $0x160] ss:$28 sps:$4 sm:$0xff]   ;;  %v3544_v13 = vld [vmem:[%s3990_s21 + $0x128] ss:$28 sps:$4 sm:$0xff]   ;;  %v1017_v14 = vpack.c.bf16 %v4077_v12, %v4075_v11  ;;  %v3546_v16 = vld [vmem:[%s3990_s21 + $0xb8] ss:$28 sps:$4 sm:$0xff]  }
 0x14f   : > { %v3547_v17 = vld [vmem:[%s3990_s21 + $0x80] ss:$28 sps:$4 sm:$0xff]   ;;  %v3548_v18 = vld [vmem:[%s3990_s21 + $0x48] ss:$28 sps:$4 sm:$0xff]   ;;  %v3549_v19 = vld [vmem:[%s3990_s21 + $0x10] ss:$28 sps:$4 sm:$0xff]  }
 0x150   : > { %1217 = vmatpush1.bf16.msra.mxu0 %v3516_v52  ;;  %1270 = vmatpush1.bf16.msra.mxu1 %v3517_v53  ;;  %v2965_v20 = vld [vmem:[%s4001_s16 + $0x8] ss:$0 sm:$0xff]  ;;  %v2954_v22 = vld [vmem:[%s4001_s16 + $0x1] ss:$0 sm:$0xff]  ;;  %v4099_v29 = vld [vmem:[%s4001_s16 + $0x7] ss:$0 sm:$0xff] }
 0x151   : > { %1218 = vmatprep.subr.bf16.mxu0 %v3518_v54  ;;  %1271 = vmatprep.subr.bf16.mxu1 %v3520_v55  ;;  %v4107_v38 = vld [vmem:[%s4001_s16 + $0x9] ss:$0 sm:$0xff] }
 0x154   : > { %1219 = vmatpush1.bf16.msra.mxu0 %v3522_v56  ;;  %1272 = vmatpush1.bf16.msra.mxu1 %v3523_v57 }
 0x155   : > { %1220 = vmatprep.subr.bf16.mxu0 %v3524_v58  ;;  %1273 = vmatprep.subr.bf16.mxu1 %v3526_v59 }
 0x158   : > { %1221 = vmatpush1.bf16.msra.mxu0 %v3528_v60  ;;  %1274 = vmatpush1.bf16.msra.mxu1 %v3529_v61 }
 0x159   : > { %1222 = vmatprep.subr.bf16.mxu0 %v3530_v62  ;;  %1275 = vmatprep.subr.bf16.mxu1 %v3532_v63 }
 0x15c   : > { %1223 = vmatpush1.bf16.msra.mxu0 %v3534_v0  ;;  %1276 = vmatpush1.bf16.msra.mxu1 %v3535_v1 }
 0x15d   : > { %1224 = vmatprep.subr.bf16.mxu0 %v3536_v2  ;;  %1277 = vmatprep.subr.bf16.mxu1 %v3538_v3 }
 0x160   : > { %1225 = vmatpush1.bf16.msra.mxu0 %v3540_v4  ;;  %1278 = vmatpush1.bf16.msra.mxu1 %v3541_v5 }
 0x161   : > { %3176 = vmatprep.subr.bf16.mxu0 %v3542_v8 }
 0x163   : > { %1243 = vmatmul.mubr.bf16.vlgmr.msra.gmra.mxu0 %v1016_v9  ;;  %1296 = vmatmul.mubr.bf16.vlgmr.msra.gmra.mxu1 %v1016_v9 }
 0x164   : > { %1252 = vmatprep.mubr.bf16.mxu0 %v3829_v39  ;;  %1305 = vmatprep.mubr.bf16.mxu1 %v3829_v39 }
 0x165   : > { %3177 = vmatpush3.bf16.msra.mxu0 %v3542_v8 }
 0x166   : > { %3178 = vmatprep.subr.bf16.mxu0 %v3543_v10 }
 0x169   : > { %3179 = vmatpush3.bf16.msra.mxu0 %v3543_v10 }
 0x16a   : > { %3180 = vmatprep.subr.bf16.mxu0 %v3544_v13 }
 0x16b   : > { %1253 = vmatmul.mubr.bf16.gmra.mxu0 %v1017_v14  ;;  %1306 = vmatmul.mubr.bf16.gmra.mxu1 %v1017_v14 }
 0x16d   : > { %3181 = vmatpush3.bf16.msra.mxu0 %v3544_v13 }
 0x16e   : > { %3182 = vmatprep.subr.bf16.mxu0 %v3545_v15 }
 0x171   : > { %3183 = vmatpush3.bf16.msra.mxu0 %v3545_v15 }
 0x172   : > { %3184 = vmatprep.subr.bf16.mxu0 %v3546_v16 }
 0x175   : > { %3185 = vmatpush3.bf16.msra.mxu0 %v3546_v16 }
 0x176   : > { %3186 = vmatprep.subr.bf16.mxu0 %v3547_v17 }
 0x179   : > { %3187 = vmatpush3.bf16.msra.mxu0 %v3547_v17 }
 0x17a   : > { %3188 = vmatprep.subr.bf16.mxu0 %v3548_v18 }
 0x17d   : > { %3189 = vmatpush3.bf16.msra.mxu0 %v3548_v18 }
 0x17e   : > { %3190 = vmatprep.subr.bf16.mxu0 %v3549_v19 }
 0x181   : > { %3191 = vmatpush3.bf16.msra.mxu0 %v3549_v19 }
 0x223   : > { %v1244_v21 = vpop.f32.mrf.mxu0  ;;  %v1297_v23 = vpop.f32.mrf.mxu1 }
 0x224   : > { %v4091_v24 = vadd.f32 %v2965_v20, %v1297_v23  ;;  %v4095_v27 = vadd.f32 %v2954_v22, %v1244_v21 }
 0x225   : > { %v4093_v25 = vpop.f32.mrf.mxu0  ;;  %v1299_v26 = vpop.f32.mrf.mxu1 }
 0x226   : > { %v1539_v28 = vmin.f32 %v4091_v24, 0.0  ;;  %v1329_v37 = vmul.f32 0.044715, %v4095_v27  ;;  %v1560_v47 = vadd.f32 %v4107_v38, %v1299_v26  ;;  %vm1531_vm5 = vcmp.gt.f32.partialorder %v4091_v24, 0.0 }
 0x227   : > { %v1248_v30 = vpop.f32.mrf.mxu0  ;;  %v1301_v31 = vpop.f32.mrf.mxu1  ;;  %v1535_v13 = vadd.f32 1.0, %v4091_v24 }
 0x228   : > { %v1543_v32 = vmul.f32 1.442695, %v1539_v28  ;;  %v4101_v33 = vadd.f32 %v2954_v22, %v1248_v30  ;;  %v4103_v34 = vadd.f32 %v2965_v20, %v1301_v31  ;;  %v1333_v52 = vmul.f32 %v1329_v37, %v4095_v27 }
 0x229   : > { %v1250_v35 = vpop.f32.mrf.mxu0  ;;  %v1303_v36 = vpop.f32.mrf.mxu1 }
 0x22a   : > { %3566 = vpow2.f32 %v1543_v32  ;;  %v4110_v40 = vadd.f32 %v4099_v29, %v1250_v35  ;;  %v1330_v41 = vmul.f32 0.044715, %v4101_v33  ;;  %v1540_v42 = vmin.f32 %v4103_v34, 0.0 }
 0x22b   : > { %v1561_v43 = vadd.f32 %v4107_v38, %v1303_v36  ;;  %v1254_v44 = vpop.f32.mrf.mxu0  ;;  %v1307_v45 = vpop.f32.mrf.mxu1  ;;  %v1337_v63 = vmul.f32 %v1333_v52, %v4095_v27  ;;  %v1536_v23 = vadd.f32 1.0, %v4103_v34  ;;  %vm1532_vm6 = vcmp.gt.f32.partialorder %v4103_v34, 0.0 }
 0x22c   : > { %v4115_v46 = vadd.f32 %v2954_v22, %v1254_v44  ;;  %v1545_v48 = vmul.f32 1.442695, %v1540_v42  ;;  %v1529_v49 = vadd.f32 %v2965_v20, %v1307_v45  ;;  %v1334_v54 = vmul.f32 %v1330_v41, %v4101_v33 }
 0x22d   : > { %3196 = vmatprep.subr.mxu1 %v1561_v43  ;;  %v4118_v50 = vpop.f32.mrf.mxu0  ;;  %v4120_v51 = vpop.f32.mrf.mxu1  ;;  %v1341_v16 = vadd.f32 %v1337_v63, %v4095_v27  ;;  %vm1499_vm12 = vcmp.gt.f32.partialorder %v4110_v40, 0.0 }
 0x22e   : > { %v1331_v53 = vmul.f32 0.044715, %v4115_v46  ;;  %3197 = vmatpush3.msra.mxu1 %v1561_v43  ;;  %3568 = vpow2.f32 %v1545_v48  ;;  %v1541_v55 = vmin.f32 %v1529_v49, 0.0  ;;  %v1338_v2 = vmul.f32 %v1334_v54, %v4101_v33 }
 0x22f   : > { %3198 = vmatprep.subr.mxu1 %v1560_v47  ;;  %v1258_v56 = vpop.f32.mrf.mxu0  ;;  %v1311_v57 = vpop.f32.mrf.mxu1  ;;  %v1537_v30 = vadd.f32 1.0, %v1529_v49  ;;  %vm1533_vm7 = vcmp.gt.f32.partialorder %v1529_v49, 0.0  ;;  %v1327_v34 = vmul.f32 0.5, %v4115_v46  ;;  %v1325_v43 = vmul.f32 0.5, %v4095_v27 }
 0x230   : > { %v1335_v58 = vmul.f32 %v1331_v53, %v4115_v46  ;;  %3199 = vmatpush3.msra.mxu1 %v1560_v47  ;;  %v1547_v59 = vmul.f32 1.442695, %v1541_v55  ;;  %v1324_v60 = vadd.f32 %v2954_v22, %v1258_v56  ;;  %v1530_v61 = vadd.f32 %v2965_v20, %v1311_v57 }
 0x231   : > { %v1313_v62 = vpop.f32.mrf.mxu1  ;;  %v1342_v17 = vadd.f32 %v1338_v2, %v4101_v33  ;;  %v1345_v20 = vmul.f32 0.7978846, %v1341_v16  ;;  %v1326_v47 = vmul.f32 0.5, %v4101_v33  ;;  %v1562_v27 = vadd.f32 %v4107_v38, %v4120_v51 }
 0x232   : > { %v1339_v0 = vmul.f32 %v1335_v58, %v4115_v46  ;;  %v4129_v1 = vadd.f32 %v4107_v38, %v1313_v62  ;;  %3570 = vpow2.f32 %v1547_v59  ;;  %v1332_v3 = vmul.f32 0.044715, %v1324_v60 }
 0x233   : > { %v1542_v4 = vmin.f32 %v1530_v61, 0.0  ;;  %v1346_v21 = vmul.f32 0.7978846, %v1342_v17  ;;  %v1538_v35 = vadd.f32 1.0, %v1530_v61  ;;  %vm1534_vm8 = vcmp.gt.f32.partialorder %v1530_v61, 0.0 }
 0x234   : > { %v1343_v5 = vadd.f32 %v1339_v0, %v4115_v46  ;;  %3224 = vmatprep.subr.mxu0 %v4129_v1  ;;  %v1336_v8 = vmul.f32 %v1332_v3, %v1324_v60  ;;  %v1328_v49 = vmul.f32 0.5, %v1324_v60 }
 0x235   : > { %v1549_v9 = vmul.f32 1.442695, %v1542_v4 }
 0x236   : > { %v1347_v10 = vmul.f32 0.7978846, %v1343_v5  ;;  %v1340_v15 = vmul.f32 %v1336_v8, %v1324_v60 }
 0x237   : > { %v3567_v14 = vpop.eup %3566  ;;  %3572 = vpow2.f32 %v1549_v9 }
 0x238   : > { %3574 = vtanh.f32 %v1347_v10  ;;  %v1551_v18 = vsel %vm1531_vm5, %v1535_v13, %v3567_v14  ;;  %v1344_v19 = vadd.f32 %v1340_v15, %v1324_v60  ;;  %v1494_v13 = vadd.f32 %v4099_v29, %v4093_v25 }
 0x239   : > { %1564 = vxpose.xlu0.b32.start [1/2] (short) %v1551_v18, 128  ;;  %3576 = vtanh.f32 %v1345_v20  ;;  %v1496_v20 = vadd.f32 %v4099_v29, %v4118_v50 }
 0x23a   : > { %v1348_v22 = vmul.f32 0.7978846, %v1344_v19  ;;  %3578 = vtanh.f32 %v1346_v21  ;;  %v1506_v16 = vmin.f32 %v1494_v13, 0.0  ;;  %vm1498_vm10 = vcmp.gt.f32.partialorder %v1494_v13, 0.0 }
 0x23b   : > { %v3569_v26 = vpop.eup %3568  ;;  %vm1500_vm11 = vcmp.gt.f32.partialorder %v1496_v20, 0.0 }
 0x23c   : > { %3580 = vtanh.f32 %v1348_v22  ;;  %v1552_v24 = vsel %vm1532_vm6, %v1536_v23, %v3569_v26  ;;  %v1510_v19 = vmul.f32 1.442695, %v1506_v16  ;;  %v1508_v22 = vmin.f32 %v1496_v20, 0.0 }
 0x23d   : > { %1565 = vxpose.xlu0.b32.end [2/2] (short) %v1552_v24, 128  ;;  %v4140_v28 = vadd.f32 %v1552_v24, %v1551_v18 }
 0x23e   : > { %3582 = vpow2.f32 %v1510_v19  ;;  %v1514_v24 = vmul.f32 1.442695, %v1508_v22 }
 0x23f   : > { %v3571_v31 = vpop.eup %3570 }
 0x240   : > { %v1553_v32 = vsel %vm1533_vm7, %v1537_v30, %v3571_v31  ;;  %3584 = vpow2.f32 %v1514_v24 }
 0x241   : > { %1790 = vxpose.xlu1.b32.start [1/2] (short) %v1553_v32, 128 }
 0x244   : > { %v3573_v36 = vpop.eup %3572 }
 0x245   : > { %v3575_v37 = vpop.eup %3574  ;;  %v1554_v41 = vsel %vm1534_vm8, %v1538_v35, %v3573_v36  ;;  %v1502_v35 = vadd.f32 1.0, %v1494_v13 }
 0x246   : > { %1791 = vxpose.xlu1.b32.end [2/2] (short) %v1554_v41, 128  ;;  %v4142_v42 = vadd.f32 %v1554_v41, %v1553_v32  ;;  %v1355_v44 = vadd.f32 1.0, %v3575_v37  ;;  %v3577_v45 = vpop.eup %3576 }
 0x247   : > { %v3579_v48 = vpop.eup %3578  ;;  %v1353_v52 = vadd.f32 1.0, %v3577_v45 }
 0x248   : > { %v1354_v54 = vadd.f32 1.0, %v3579_v48  ;;  %v1359_v57 = vmul.f32 %v1355_v44, %v1327_v34  ;;  %v1504_v44 = vadd.f32 1.0, %v1496_v20 }
 0x249   : > { %v3581_v53 = vpop.eup %3580  ;;  %v1357_v55 = vmul.f32 %v1353_v52, %v1325_v43 }
 0x24a   : > { %v1356_v56 = vadd.f32 1.0, %v3581_v53  ;;  %v1358_v58 = vmul.f32 %v1354_v54, %v1326_v47 }
 0x24b   : > { %v3583_v36 = vpop.eup %3582 }
 0x24c   : > { %v1360_v59 = vmul.f32 %v1356_v56, %v1328_v49  ;;  %v1361_v61 = vpack.c.bf16 %v1358_v58, %v1357_v55  ;;  %v4190_v34 = vsel %vm1498_vm10, %v1502_v35, %v3583_v36 }
 0x24d   : > { %v3585_v45 = vpop.eup %3584 }
 0x24e   : > { %v1362_v62 = vpack.c.bf16 %v1360_v59, %v1359_v57  ;;  %3192 = vmatprep.mubr.bf16.mxu0 %v1361_v61  ;;  %v4195_v48 = vsel %vm1500_vm11, %v1504_v44, %v3585_v45 }
 0x250   : > { %3193 = vmatmul.mubr.bf16.vlgmr.msra.gmra.mxu0 %v1362_v62 }
 0x251   : > { %3225 = vmatpush3.msra.mxu0 %v4129_v1 }
 0x252   : > { %3226 = vmatprep.subr.mxu0 %v1562_v27 }
 0x253   : > { %3227 = vmatpush3.msra.mxu0 %v1562_v27 }
 0x264   : > { %3493 = vset.pattern.permute.xlu1 %v3829_v39 }
 0x266   : > { %3492 = vset.pattern.permute.xlu0 %v3829_v39 }
 0x2a2   : > { %777 = vadd.xlane.f32.xlu0 %v4067_v6 }
 0x2a5   : > { %779 = vadd.xlane.f32.xlu1 %v4069_v7 }
 0x2a9   : > { %781 = vadd.xlane.f32.xlu1 %v4075_v11 }
 0x2ad   : > { %783 = vadd.xlane.f32.xlu1 %v4077_v12 }
 0x2b5   : > { %v1580_v33 = vpop.trf.xlu0 }
 0x2b6   : > { %3200 = vmatprep.mubr.msk.f32.mxu1 %vm1596_vm9, %v1580_v33 }
 0x2b9   : > { %v1581_v38 = vpop.trf.xlu0 }
 0x2ba   : > { %3201 = vmatmul.mubr.msk.f32.vlgmr.msra.gmra.mxu1 %vm1596_vm9, %v1581_v38 }
 0x2bd   : > { %v1582_v46 = vpop.trf.xlu0 }
 0x2be   : > { %v1806_v51 = vpop.trf.xlu1  ;;  %3203 = vmatprep.mubr.msk.f32.mxu1 %vm1596_vm9, %v1582_v46  ;;  %v639_v46 = vld [vmem:[#allocation3 + $0x8] sm:$0xff] }
 0x2bf   : > { %3228 = vmatprep.mubr.msk.f32.mxu0 %vm1596_vm9, %v1806_v51  ;;  %v638_v51 = vld [vmem:[#allocation3] sm:$0xff] }
 0x2c1   : > { %v1583_v39 = vpop.trf.xlu0 }
 0x2c2   : > { %v1807_v60 = vpop.trf.xlu1  ;;  %3204 = vmatmul.mubr.msk.f32.gmra.mxu1 %vm1596_vm9, %v1583_v39  ;;  %v1507_v39 = vmin.f32 %v4110_v40, 0.0 }
 0x2c3   : > { %3229 = vmatmul.mubr.msk.f32.vlgmr.msra.gmra.mxu0 %vm1596_vm9, %v1807_v60  ;;  %v1260_v60 = vpop.f32.mrf.mxu0 }
 0x2c5   : > { %v1584_v63 = vpop.trf.xlu0 }
 0x2c6   : > { %v1808_v0 = vpop.trf.xlu1  ;;  %3206 = vmatprep.mubr.msk.f32.mxu1 %vm1596_vm9, %v1584_v63  ;;  %v640_v63 = vld [vmem:[#allocation3 + $0x10] sm:$0xff] }
 0x2c7   : > { %3231 = vmatprep.mubr.msk.f32.mxu0 %vm1596_vm9, %v1808_v0  ;;  %v2166_v0 = vrot.slane %v4140_v28, 4 }
 0x2c9   : > { %v1585_v1 = vpop.trf.xlu0 }
 0x2ca   : > { %v1809_v2 = vpop.trf.xlu1  ;;  %3207 = vmatmul.mubr.msk.f32.gmra.mxu1 %vm1596_vm9, %v1585_v1  ;;  %v1512_v1 = vmul.f32 1.442695, %v1507_v39 }
 0x2cb   : > { %3232 = vmatmul.mubr.msk.f32.gmra.mxu0 %vm1596_vm9, %v1809_v2  ;;  %v642_v2 = vld [vmem:[#allocation4] sm:$0xff] }
 0x2cc   : > { %3586 = vpow2.f32 %v1512_v1 }
 0x2cd   : > { %v1586_v3 = vpop.trf.xlu0 }
 0x2ce   : > { %v1810_v4 = vpop.trf.xlu1  ;;  %3209 = vmatprep.mubr.msk.f32.mxu1 %vm1596_vm9, %v1586_v3  ;;  %v2167_v3 = vadd.f32 %v2166_v0, %v4140_v28  ;;  %v1503_v28 = vadd.f32 1.0, %v4110_v40 }
 0x2cf   : > { %3234 = vmatprep.mubr.msk.f32.mxu0 %vm1596_vm9, %v1810_v4  ;;  %v2173_v4 = vrot.slane %v4142_v42, 4 }
 0x2d1   : > { %v1587_v5 = vpop.trf.xlu0 }
 0x2d2   : > { %v1811_v8 = vpop.trf.xlu1  ;;  %3210 = vmatmul.mubr.msk.f32.gmra.mxu1 %vm1596_vm9, %v1587_v5 }
 0x2d3   : > { %3235 = vmatmul.mubr.msk.f32.gmra.mxu0 %vm1596_vm9, %v1811_v8  ;;  %v643_v8 = vld [vmem:[#allocation4 + $0x8] sm:$0xff] }
 0x2d5   : > { %v1588_v9 = vpop.trf.xlu0 }
 0x2d6   : > { %v1812_v10 = vpop.trf.xlu1  ;;  %3212 = vmatprep.mubr.msk.f32.mxu1 %vm1596_vm9, %v1588_v9  ;;  %v2168_v9 = vrot.slane %v2167_v3, 2 }
 0x2d7   : > { %3237 = vmatprep.mubr.msk.f32.mxu0 %vm1596_vm9, %v1812_v10  ;;  %v2174_v10 = vadd.f32 %v2173_v4, %v4142_v42 }
 0x2d8   : > { %v2169_v16 = vadd.f32 %v2168_v9, %v2167_v3 }
 0x2d9   : > { %v1589_v14 = vpop.trf.xlu0  ;;  %v3587_v19 = vpop.eup %3586 }
 0x2da   : > { %v1813_v15 = vpop.trf.xlu1  ;;  %3213 = vmatmul.mubr.msk.f32.gmra.mxu1 %vm1596_vm9, %v1589_v14  ;;  %v645_v14 = vld [vmem:[#allocation4 + $0x18] sm:$0xff] }
 0x2db   : > { %3238 = vmatmul.mubr.msk.f32.gmra.mxu0 %vm1596_vm9, %v1813_v15  ;;  %v2175_v15 = vrot.slane %v2174_v10, 2 }
 0x2dd   : > { %v1590_v17 = vpop.trf.xlu0 }
 0x2de   : > { %v1814_v18 = vpop.trf.xlu1  ;;  %3215 = vmatprep.mubr.msk.f32.mxu1 %vm1596_vm9, %v1590_v17  ;;  %v2170_v17 = vrot.slane %v2169_v16, 1 }
 0x2df   : > { %3240 = vmatprep.mubr.msk.f32.mxu0 %vm1596_vm9, %v1814_v18  ;;  %v2176_v18 = vadd.f32 %v2175_v15, %v2174_v10 }
 0x2e0   : > { %v2171_v20 = vadd.f32 %v2170_v17, %v2169_v16 }
 0x2e1   : > { %v1591_v25 = vpop.trf.xlu0 }
 0x2e2   : > { %v1815_v21 = vpop.trf.xlu1  ;;  %3216 = vmatmul.mubr.msk.f32.gmra.mxu1 %vm1596_vm9, %v1591_v25  ;;  %v2177_v25 = vrot.slane %v2176_v18, 1 }
 0x2e3   : > { %3241 = vmatmul.mubr.msk.f32.gmra.mxu0 %vm1596_vm9, %v1815_v21  ;;  %v4226_v21 = vsel %vm1499_vm12, %v1503_v28, %v3587_v19 }
 0x2e4   : > { %v2180_v42 = vmul.f32 %v2171_v20, %v4226_v21  ;;  %v2178_v22 = vadd.f32 %v2177_v25, %v2176_v18 }
 0x2e5   : > { %v1592_v23 = vpop.trf.xlu0 }
 0x2e6   : > { %v1816_v26 = vpop.trf.xlu1  ;;  %3218 = vmatprep.mubr.msk.f32.mxu1 %vm1596_vm9, %v1592_v23  ;;  %v2181_v24 = vmul.f32 %v2178_v22, %v4195_v48 }
 0x2e7   : > { %3243 = vmatprep.mubr.msk.f32.mxu0 %vm1596_vm9, %v1816_v26 }
 0x2e9   : > { %v1593_v50 = vpop.trf.xlu0 }
 0x2ea   : > { %v1817_v30 = vpop.trf.xlu1  ;;  %3219 = vmatmul.mubr.msk.f32.gmra.mxu1 %vm1596_vm9, %v1593_v50 }
 0x2eb   : > { %3244 = vmatmul.mubr.msk.f32.gmra.mxu0 %vm1596_vm9, %v1817_v30 }
 0x2ed   : > { %v1594_v31 = vpop.trf.xlu0 }
 0x2ee   : > { %v1818_v32 = vpop.trf.xlu1  ;;  %3221 = vmatprep.mubr.msk.f32.mxu1 %vm1596_vm9, %v1594_v31 }
 0x2ef   : > { %3246 = vmatprep.mubr.msk.f32.mxu0 %vm1596_vm9, %v1818_v32  ;;  %v2179_v32 = vmul.f32 %v2171_v20, %v4190_v34 }
 0x2f1   : > { %v1595_v37 = vpop.trf.xlu0 }
 0x2f2   : > { %v1819_v41 = vpop.trf.xlu1  ;;  %3222 = vmatmul.mubr.msk.f32.gmra.mxu1 %vm1596_vm9, %v1595_v37 }
 0x2f3   : > { %3247 = vmatmul.mubr.msk.f32.gmra.mxu0 %vm1596_vm9, %v1819_v41  ;;  %3284 = vmatprep.mubr.f32.mxu1 %v4190_v34 }
 0x2f6   : > { %v1820_v43 = vpop.trf.xlu1 }
 0x2f7   : > { %3249 = vmatprep.mubr.msk.f32.mxu0 %vm1596_vm9, %v1820_v43 }
 0x2fa   : > { %v1821_v47 = vpop.trf.xlu1 }
 0x2fb   : > { %3250 = vmatmul.mubr.msk.f32.gmra.mxu0 %vm1596_vm9, %v1821_v47 }
 0x2fc   : > { %3319 = vmatprep.mubr.f32.mxu0 %v4195_v48 }
 0x310   : > { %v4233_v40 = vpop.f32.mrf.mxu0 }
 0x312   : > { %v4235_v31 = vpop.f32.mrf.mxu0 }
 0x314   : > { %v4240_v36 = vpop.f32.mrf.mxu0 }
 0x316   : > { %v4244_v41 = vpop.f32.mrf.mxu0 }
 0x32b   : > { %v778_v49 = vpop.xlane.xlu0 %777 }
 0x32c   : > { %v786_v52 = vmul.f32 0.0078125, %v778_v49 }
 0x32e   : > { %v780_v53 = vpop.xlane.xlu1 %779  ;;  %v4199_v54 = vsub.f32 %v4067_v6, %v786_v52 }
 0x32f   : > { %v787_v55 = vmul.f32 0.0078125, %v780_v53 }
 0x330   : > { %v794_v57 = vmul.f32 %v4199_v54, %v4199_v54 }
 0x331   : > { %v4202_v56 = vsub.f32 %v4069_v7, %v787_v55 }
 0x332   : > { %v782_v58 = vpop.xlane.xlu1 %781  ;;  %798 = vadd.xlane.f32.xlu0 %v794_v57 }
 0x333   : > { %v788_v59 = vmul.f32 0.0078125, %v782_v58  ;;  %v795_v61 = vmul.f32 %v4202_v56, %v4202_v56 }
 0x335   : > { %v4209_v62 = vsub.f32 %v4075_v11, %v788_v59  ;;  %800 = vadd.xlane.f32.xlu1 %v795_v61  ;;  %v641_v11 = vld [vmem:[#allocation3 + $0x18] sm:$0xff] }
 0x336   : > { %v784_v27 = vpop.xlane.xlu1 %783 }
 0x337   : > { %v789_v6 = vmul.f32 0.0078125, %v784_v27  ;;  %v796_v33 = vmul.f32 %v4209_v62, %v4209_v62 }
 0x339   : > { %v4214_v7 = vsub.f32 %v4077_v12, %v789_v6  ;;  %802 = vadd.xlane.f32.xlu0 %v796_v33  ;;  %v1497_v12 = vadd.f32 %v4099_v29, %v1260_v60  ;;  %v644_v29 = vld [vmem:[#allocation4 + $0x10] sm:$0xff] }
 0x33b   : > { %v797_v38 = vmul.f32 %v4214_v7, %v4214_v7  ;;  %v1509_v5 = vmin.f32 %v1497_v12, 0.0  ;;  %v1505_v23 = vadd.f32 1.0, %v1497_v12  ;;  %vm1501_vm13 = vcmp.gt.f32.partialorder %v1497_v12, 0.0 }
 0x33d   : > { %804 = vadd.xlane.f32.xlu1 %v797_v38  ;;  %v1516_v13 = vmul.f32 1.442695, %v1509_v5 }
 0x33f   : > { %3588 = vpow2.f32 %v1516_v13 }
 0x34c   : > { %v3589_v26 = vpop.eup %3588 }
 0x34d   : > { %v4230_v50 = vsel %vm1501_vm13, %v1505_v23, %v3589_v26 }
 0x34e   : > { %669 = vperm.xlu1 %3493, %v639_v46   ;;  %v2182_v30 = vmul.f32 %v2178_v22, %v4230_v50 }
 0x34f   : > { %664 = vperm.xlu0 %3492, %v638_v51  }
 0x352   : > { %679 = vperm.xlu1 %3493, %v641_v11  }
 0x356   : > { %674 = vperm.xlu1 %3493, %v640_v63  }
 0x35a   : > { %697 = vperm.xlu1 %3493, %v642_v2  }
 0x35e   : > { %702 = vperm.xlu1 %3493, %v643_v8  }
 0x362   : > { %712 = vperm.xlu1 %3493, %v645_v14  }
 0x366   : > { %707 = vperm.xlu1 %3493, %v644_v29  }
 0x36e   : > { %2185 = vadd.xlane.f32.xlu0 %v2180_v42 }
 0x372   : > { %2187 = vadd.xlane.f32.xlu0 %v2181_v24 }
 0x376   : > { %2189 = vadd.xlane.f32.xlu0 %v2182_v30  ;;  %v2906_v30 = vld [vmem:[%s4001_s16 + $0x3] ss:$0 sm:$0xff] }
 0x37a   : > { %v4238_v35 = vpop.f32.mrf.mxu1 }
 0x37c   : > { %v4242_v37 = vpop.f32.mrf.mxu1 }
 0x382   : > { %v4246_v43 = vpop.f32.mrf.mxu1 }
 0x383   : > { %v4248_v44 = vpop.f32.mrf.mxu0 }
 0x384   : > { %v4250_v45 = vpop.f32.mrf.mxu1 }
 0x385   : > { %v4252_v47 = vpop.f32.mrf.mxu0 }
 0x38a   : > { %2183 = vadd.xlane.f32.xlu1 %v2179_v32  ;;  %v3208_v48 = vpop.f32.mrf.mxu1 }
 0x38b   : > { %v4254_v49 = vpop.f32.mrf.mxu0 }
 0x38c   : > { %v1731_v34 = vpop.f32.mrf.mxu1 }
 0x38d   : > { %v4256_v52 = vpop.f32.mrf.mxu0 }
 0x392   : > { %v3211_v53 = vpop.f32.mrf.mxu1 }
 0x393   : > { %v4258_v55 = vpop.f32.mrf.mxu0 }
 0x394   : > { %v1741_v57 = vpop.f32.mrf.mxu1 }
 0x395   : > { %v4260_v58 = vpop.f32.mrf.mxu0 }
 0x39a   : > { %v3214_v59 = vpop.f32.mrf.mxu1 }
 0x39b   : > { %v3239_v61 = vpop.f32.mrf.mxu0 }
 0x39c   : > { %v1751_v27 = vpop.f32.mrf.mxu1 }
 0x39d   : > { %v1966_v6 = vpop.f32.mrf.mxu0 }
 0x3a2   : > { %v3217_v33 = vpop.f32.mrf.mxu1 }
 0x3a3   : > { %v3242_v38 = vpop.f32.mrf.mxu0 }
 0x3a4   : > { %v1761_v46 = vpop.f32.mrf.mxu1 }
 0x3a5   : > { %v1976_v51 = vpop.f32.mrf.mxu0 }
 0x3aa   : > { %v3220_v11 = vpop.f32.mrf.mxu1 }
 0x3ab   : > { %v3245_v39 = vpop.f32.mrf.mxu0 }
 0x3ac   : > { %v1771_v60 = vpop.f32.mrf.mxu1 }
 0x3ad   : > { %v1986_v63 = vpop.f32.mrf.mxu0 }
 0x3b2   : > { %v3223_v0 = vpop.f32.mrf.mxu1 }
 0x3b3   : > { %3252 = vmatprep.subr.mxu1 %v3223_v0  ;;  %v3248_v1 = vpop.f32.mrf.mxu0 }
 0x3b4   : > { %v1781_v12 = vpop.f32.mrf.mxu1  ;;  %3253 = vmatpush3.msra.mxu1 %v3223_v0  ;;  %v2912_v0 = vld [vmem:[%s4006_s12 + $0x5] ss:$0 sm:$0xff] }
 0x3b5   : > { %3254 = vmatprep.subr.mxu1 %v1781_v12  ;;  %v1996_v2 = vpop.f32.mrf.mxu0 }
 0x3b6   : > { %3255 = vmatpush3.msra.mxu1 %v1781_v12 }
 0x3b7   : > { %3256 = vmatprep.subr.mxu1 %v3220_v11 }
 0x3b8   : > { %3257 = vmatpush3.msra.mxu1 %v3220_v11 }
 0x3b9   : > { %3258 = vmatprep.subr.mxu1 %v1771_v60 }
 0x3ba   : > { %3259 = vmatpush3.msra.mxu1 %v1771_v60 }
 0x3bb   : > { %v3251_v3 = vpop.f32.mrf.mxu0  ;;  %3260 = vmatprep.subr.mxu1 %v3217_v33  ;;  %v799_v8 = vpop.xlane.xlu0 %798 }
 0x3bc   : > { %3287 = vmatprep.subr.mxu0 %v3251_v3  ;;  %3261 = vmatpush3.msra.mxu1 %v3217_v33  ;;  %v806_v14 = vmul.f32 0.0078125, %v799_v8 }
 0x3bd   : > { %v2006_v4 = vpop.f32.mrf.mxu0  ;;  %3288 = vmatpush3.msra.mxu0 %v3251_v3  ;;  %3262 = vmatprep.subr.mxu1 %v1761_v46 }
 0x3be   : > { %3289 = vmatprep.subr.mxu0 %v2006_v4  ;;  %3263 = vmatpush3.msra.mxu1 %v1761_v46  ;;  %v801_v5 = vpop.xlane.xlu1 %800  ;;  %v810_v17 = vadd.f32 1e-05, %v806_v14  ;;  %v2913_v14 = vld [vmem:[%s4006_s12 + $0x6] ss:$0 sm:$0xff] }
 0x3bf   : > { %3290 = vmatpush3.msra.mxu0 %v2006_v4  ;;  %3264 = vmatprep.subr.mxu1 %v3214_v59  ;;  %v807_v15 = vmul.f32 0.0078125, %v801_v5 }
 0x3c0   : > { %3291 = vmatprep.subr.mxu0 %v3248_v1  ;;  %3265 = vmatpush3.msra.mxu1 %v3214_v59 }
 0x3c1   : > { %3292 = vmatpush3.msra.mxu0 %v3248_v1  ;;  %3266 = vmatprep.subr.mxu1 %v1751_v27  ;;  %v811_v18 = vadd.f32 1e-05, %v807_v15 }
 0x3c2   : > { %3293 = vmatprep.subr.mxu0 %v1996_v2  ;;  %3267 = vmatpush3.msra.mxu1 %v1751_v27  ;;  %v803_v13 = vpop.xlane.xlu0 %802 }
 0x3c3   : > { %3294 = vmatpush3.msra.mxu0 %v1996_v2  ;;  %3268 = vmatprep.subr.mxu1 %v3211_v53  ;;  %v808_v16 = vmul.f32 0.0078125, %v803_v13 }
 0x3c4   : > { %3295 = vmatprep.subr.mxu0 %v3245_v39  ;;  %3269 = vmatpush3.msra.mxu1 %v3211_v53 }
 0x3c5   : > { %3296 = vmatpush3.msra.mxu0 %v3245_v39  ;;  %3270 = vmatprep.subr.mxu1 %v1741_v57  ;;  %v812_v28 = vadd.f32 1e-05, %v808_v16 }
 0x3c6   : > { %3297 = vmatprep.subr.mxu0 %v1986_v63  ;;  %3271 = vmatpush3.msra.mxu1 %v1741_v57  ;;  %v805_v9 = vpop.xlane.xlu1 %804 }
 0x3c7   : > { %3298 = vmatpush3.msra.mxu0 %v1986_v63  ;;  %3272 = vmatprep.subr.mxu1 %v3208_v48  ;;  %v809_v10 = vmul.f32 0.0078125, %v805_v9  ;;  %v2911_v63 = vld [vmem:[%s4006_s12 + $0x4] ss:$0 sm:$0xff] }
 0x3c8   : > { %3299 = vmatprep.subr.mxu0 %v3242_v38  ;;  %3273 = vmatpush3.msra.mxu1 %v3208_v48 }
 0x3c9   : > { %3300 = vmatpush3.msra.mxu0 %v3242_v38  ;;  %3274 = vmatprep.subr.mxu1 %v1731_v34  ;;  %v813_v29 = vadd.f32 1e-05, %v809_v10 }
 0x3ca   : > { %3301 = vmatprep.subr.mxu0 %v1976_v51  ;;  %3275 = vmatpush3.msra.mxu1 %v1731_v34  ;;  %v4284_v19 = vpop.permute.xlu1 %669 }
 0x3cb   : > { %3302 = vmatpush3.msra.mxu0 %v1976_v51  ;;  %3276 = vmatprep.subr.mxu1 %v4246_v43  ;;  %3590 = vrsqrt.f32 %v813_v29 }
 0x3cc   : > { %3303 = vmatprep.subr.mxu0 %v3239_v61  ;;  %3277 = vmatpush3.msra.mxu1 %v4246_v43  ;;  %3592 = vrsqrt.f32 %v810_v17  ;;  %v655_v43 = vlaneseq }
 0x3cd   : > { %3304 = vmatpush3.msra.mxu0 %v3239_v61  ;;  %3278 = vmatprep.subr.mxu1 %v4250_v45  ;;  %3594 = vrsqrt.f32 %v811_v18 }
 0x3ce   : > { %3305 = vmatprep.subr.mxu0 %v1966_v6  ;;  %3279 = vmatpush3.msra.mxu1 %v4250_v45  ;;  %3596 = vrsqrt.f32 %v812_v28  ;;  %v4286_v20 = vpop.permute.xlu1 %679  ;;  %v4298_v34 = vshrl.u32 %v655_v43, 7  ;;  %v2914_v43 = vld [vmem:[%s4001_s16 + $0x5] ss:$0 sm:$0xff] }
 0x3cf   : > { %3306 = vmatpush3.msra.mxu0 %v1966_v6  ;;  %3280 = vmatprep.subr.mxu1 %v4238_v35 }
 0x3d0   : > { %3307 = vmatprep.subr.mxu0 %v4258_v55  ;;  %3281 = vmatpush3.msra.mxu1 %v4238_v35  ;;  %vm657_vm14 = vcmp.lt.s32.totalorder %v4298_v34, 1  ;;  %vm690_vm15 = vcmp.lt.s32.totalorder %v4298_v34, 7 }
 0x3d1   : > { %3308 = vmatpush3.msra.mxu0 %v4258_v55  ;;  %3282 = vmatprep.subr.mxu1 %v4242_v37 }
 0x3d2   : > { %3309 = vmatprep.subr.mxu0 %v4260_v58  ;;  %3283 = vmatpush3.msra.mxu1 %v4242_v37  ;;  %v4290_v24 = vpop.permute.xlu1 %674 }
 0x3d3   : > { %3310 = vmatpush3.msra.mxu0 %v4260_v58  ;;  %3285 = vmatmul.mubr.f32.vlgmr.msra.gmra.mxu1 %v4226_v21  ;;  %v4303_v58 = vpop.permute.xlu0 %664 }
 0x3d4   : > { %3311 = vmatprep.subr.mxu0 %v4254_v49 }
 0x3d5   : > { %3312 = vmatpush3.msra.mxu0 %v4254_v49 }
 0x3d6   : > { %3313 = vmatprep.subr.mxu0 %v4256_v52  ;;  %v4296_v49 = vpop.permute.xlu1 %697 }
 0x3d7   : > { %3314 = vmatpush3.msra.mxu0 %v4256_v52 }
 0x3d8   : > { %3315 = vmatprep.subr.mxu0 %v4248_v44  ;;  %v3591_v25 = vpop.eup %3590 }
 0x3d9   : > { %3316 = vmatpush3.msra.mxu0 %v4248_v44  ;;  %v3593_v21 = vpop.eup %3592  ;;  %v821_v22 = vmul.f32 %v3591_v25, %v4214_v7  ;;  %v2907_v44 = vld [vmem:[%s4001_s16 + $0x4] ss:$0 sm:$0xff] }
 0x3da   : > { %3317 = vmatprep.subr.mxu0 %v4252_v47  ;;  %v3595_v42 = vpop.eup %3594  ;;  %v818_v26 = vmul.f32 %v3593_v21, %v4199_v54 }
 0x3db   : > { %3318 = vmatpush3.msra.mxu0 %v4252_v47  ;;  %v3597_v23 = vpop.eup %3596  ;;  %v829_v35 = vmul.f32 %v2906_v30, %v821_v22 }
 0x3dc   : > { %3320 = vmatmul.mubr.f32.vlgmr.msra.gmra.mxu0 %v4230_v50  ;;  %v819_v50 = vmul.f32 %v3595_v42, %v4202_v56  ;;  %v820_v32 = vmul.f32 %v3597_v23, %v4209_v62  ;;  %v826_v37 = vmul.f32 %v2906_v30, %v818_v26  ;;  %v4300_v56 = vpop.permute.xlu1 %702 }
 0x3dd   : > { %v837_v48 = vadd.f32 %v2907_v44, %v829_v35 }
 0x3de   : > { %v827_v45 = vmul.f32 %v2906_v30, %v819_v50  ;;  %v828_v47 = vmul.f32 %v2906_v30, %v820_v32  ;;  %v834_v7 = vadd.f32 %v2907_v44, %v826_v37 }
 0x3df   : > { %v846_v53 = vrot.slane %v837_v48, 7  ;;  %v858_v51 = vrot.slane %v837_v48, 1  ;;  %v882_v29 = vmul.f32 %v2912_v0, %v837_v48 }
 0x3e0   : > { %v835_v54 = vadd.f32 %v2907_v44, %v827_v45  ;;  %v836_v52 = vadd.f32 %v2907_v44, %v828_v47  ;;  %v843_v55 = vrot.slane %v834_v7, 7  ;;  %v855_v46 = vrot.slane %v834_v7, 1  ;;  %v4313_v11 = vpop.permute.xlu1 %712 }
 0x3e1   : > { %v879_v10 = vmul.f32 %v2912_v0, %v834_v7 }
 0x3e2   : > { %v844_v62 = vrot.slane %v835_v54, 7  ;;  %v845_v57 = vrot.slane %v836_v52, 7  ;;  %v850_v59 = vsel %vm657_vm14, %v846_v53, %v843_v55  ;;  %v857_v61 = vrot.slane %v836_v52, 1 }
 0x3e3   : > { %v856_v6 = vrot.slane %v835_v54, 1  ;;  %v851_v38 = vmul.f32 %v850_v59, %v4303_v58  ;;  %v862_v5 = vsel %vm690_vm15, %v858_v51, %v855_v46  ;;  %v880_v25 = vmul.f32 %v2912_v0, %v835_v54 }
 0x3e4   : > { %v847_v27 = vsel %vm657_vm14, %v845_v57, %v846_v53  ;;  %v849_v33 = vsel %vm657_vm14, %v843_v55, %v844_v62  ;;  %v848_v3 = vsel %vm657_vm14, %v844_v62, %v845_v57  ;;  %v859_v15 = vsel %vm690_vm15, %v857_v61, %v858_v51  ;;  %v4332_v16 = vpop.permute.xlu1 %707 }
 0x3e5   : > { %v854_v39 = vmul.f32 %v847_v27, %v4286_v20  ;;  %v860_v60 = vsel %vm690_vm15, %v856_v6, %v857_v61  ;;  %v852_v1 = vmul.f32 %v849_v33, %v4284_v19  ;;  %v861_v12 = vsel %vm690_vm15, %v855_v46, %v856_v6 }
 0x3e6   : > { %v871_v2 = vmul.f32 %v2911_v63, %v851_v38  ;;  %v864_v4 = vmul.f32 %v860_v60, %v4300_v56  ;;  %v863_v9 = vmul.f32 %v861_v12, %v4296_v49  ;;  %v853_v17 = vmul.f32 %v848_v3, %v4290_v24 }
 0x3e7   : > { %v874_v8 = vmul.f32 %v2911_v63, %v854_v39  ;;  %v872_v13 = vmul.f32 %v2911_v63, %v852_v1  ;;  %v866_v18 = vmul.f32 %v862_v5, %v4313_v11  ;;  %v865_v23 = vmul.f32 %v859_v15, %v4332_v16  ;;  %v4344_v5 = vld [vmem:[#allocation2] sm:$0xff] }
 0x3e8   : > { %v883_v28 = vadd.f32 %v879_v10, %v871_v2  ;;  %v892_v21 = vmul.f32 %v2913_v14, %v864_v4  ;;  %v891_v22 = vmul.f32 %v2913_v14, %v863_v9  ;;  %v873_v50 = vmul.f32 %v2911_v63, %v853_v17  ;;  %v4347_v9 = vld [vmem:[#allocation2 + $0x10] sm:$0xff] }
 0x3e9   : > { %v886_v42 = vadd.f32 %v882_v29, %v874_v8  ;;  %v884_v26 = vadd.f32 %v880_v25, %v872_v13  ;;  %v894_v30 = vmul.f32 %v2913_v14, %v866_v18  ;;  %v881_v37 = vmul.f32 %v2912_v0, %v836_v52  ;;  %v4350_v13 = vld [vmem:[#allocation2 + $0x8] sm:$0xff]  ;;  %v4356_v25 = vld [vmem:[#allocation2 + $0x18] sm:$0xff] }
 0x3ea   : > { %v895_v32 = vadd.f32 %v891_v22, %v883_v28  ;;  %v893_v45 = vmul.f32 %v2913_v14, %v865_v23  ;;  %v652_v8 = vrot.slane %v4344_v5, 7  ;;  %v651_v10 = vrot.slane %v4347_v9, 7 }
 0x3eb   : > { %v896_v35 = vadd.f32 %v892_v21, %v884_v26  ;;  %v898_v44 = vadd.f32 %v894_v30, %v886_v42  ;;  %v885_v47 = vadd.f32 %v881_v37, %v873_v50  ;;  %v654_v14 = vrot.slane %v4350_v13, 7  ;;  %v2901_v26 = vld [vmem:[%s4006_s12] ss:$0 sm:$0xff]  ;;  %v2902_v30 = vld [vmem:[%s4006_s12 + $0x1] ss:$0 sm:$0xff] }
 0x3ec   : > { %v903_v48 = vadd.f32 %v2914_v43, %v895_v32  ;;  %v660_v17 = vsel %vm657_vm14, %v651_v10, %v652_v8  ;;  %v687_v28 = vrot.slane %v4344_v5, 1  ;;  %v688_v21 = vrot.slane %v4356_v25, 1 }
 0x3ed   : > { %v904_v7 = vadd.f32 %v2914_v43, %v896_v35  ;;  %v906_v53 = vadd.f32 %v2914_v43, %v898_v44  ;;  %v897_v55 = vadd.f32 %v893_v45, %v885_v47  ;;  %v686_v42 = vrot.slane %v4347_v9, 1 }
 0x3ee   : > { %v911_v54 = vmul.f32 0.044715, %v903_v48  ;;  %v661_v22 = vsel %vm657_vm14, %v654_v14, %v651_v10  ;;  %v683_v50 = vmul.f32 %v4284_v19, %v660_v17  ;;  %v907_v32 = vmul.f32 0.5, %v903_v48 }
 0x3ef   : > { %v912_v62 = vmul.f32 0.044715, %v904_v7  ;;  %v914_v57 = vmul.f32 0.044715, %v906_v53  ;;  %v4338_v59 = vadd.f32 %v2914_v43, %v897_v55  ;;  %v653_v44 = vrot.slane %v4356_v25, 7 }
 0x3f0   : > { %v915_v61 = vmul.f32 %v911_v54, %v903_v48  ;;  %v692_v45 = vsel %vm690_vm15, %v687_v28, %v688_v21  ;;  %v682_v47 = vmul.f32 %v4303_v58, %v661_v22  ;;  %v693_v55 = vsel %vm690_vm15, %v686_v42, %v687_v28 }
 0x3f1   : > { %v916_v27 = vmul.f32 %v912_v62, %v904_v7  ;;  %v918_v6 = vmul.f32 %v914_v57, %v906_v53  ;;  %v913_v33 = vmul.f32 0.044715, %v4338_v59  ;;  %v908_v54 = vmul.f32 0.5, %v904_v7 }
 0x3f2   : > { %v919_v38 = vmul.f32 %v915_v61, %v903_v48  ;;  %v910_v62 = vmul.f32 0.5, %v906_v53  ;;  %v724_v61 = vmul.f32 %v2901_v26, %v683_v50  ;;  %v733_v28 = vmul.f32 %v4356_v25, %v2902_v30 }
 0x3f3   : > { %v920_v52 = vmul.f32 %v916_v27, %v904_v7  ;;  %v922_v46 = vmul.f32 %v918_v6, %v906_v53  ;;  %v917_v51 = vmul.f32 %v913_v33, %v4338_v59  ;;  %v716_v27 = vmul.f32 %v4300_v56, %v692_v45  ;;  %v2918_v45 = vld [vmem:[%s4006_s12 + $0x8] ss:$0 sm:$0xff] }
 0x3f4   : > { %v923_v39 = vadd.f32 %v919_v38, %v903_v48  ;;  %v732_v48 = vmul.f32 %v4344_v5, %v2902_v30 }
 0x3f5   : > { %v924_v60 = vadd.f32 %v920_v52, %v904_v7  ;;  %v926_v63 = vadd.f32 %v922_v46, %v906_v53  ;;  %v921_v0 = vmul.f32 %v917_v51, %v4338_v59  ;;  %v2903_v52 = vld [vmem:[%s4006_s12 + $0x2] ss:$0 sm:$0xff]  ;;  %v715_v46 = vmul.f32 %v4296_v49, %v693_v55 }
 0x3f6   : > { %v927_v1 = vmul.f32 0.7978846, %v923_v39  ;;  %v723_v51 = vmul.f32 %v2901_v26, %v682_v47  ;;  %v731_v39 = vmul.f32 %v4347_v9, %v2902_v30  ;;  %v658_v7 = vsel %vm657_vm14, %v653_v44, %v654_v14 }
 0x3f7   : > { %v928_v12 = vmul.f32 0.7978846, %v924_v60  ;;  %v930_v2 = vmul.f32 0.7978846, %v926_v63  ;;  %v925_v3 = vadd.f32 %v921_v0, %v4338_v59  ;;  %v659_v53 = vsel %vm657_vm14, %v652_v8, %v653_v44 }
 0x3f8   : > { %3598 = vtanh.f32 %v927_v1  ;;  %v909_v63 = vmul.f32 0.5, %v4338_v59  ;;  %v736_v0 = vadd.f32 %v732_v48, %v724_v61  ;;  %v689_v1 = vrot.slane %v4350_v13, 1 }
 0x3f9   : > { %3600 = vtanh.f32 %v928_v12  ;;  %v929_v4 = vmul.f32 0.7978846, %v925_v3  ;;  %v744_v12 = vmul.f32 %v2903_v52, %v716_v27  ;;  %v685_v10 = vmul.f32 %v4286_v20, %v658_v7 }
 0x3fa   : > { %3602 = vtanh.f32 %v930_v2  ;;  %v684_v14 = vmul.f32 %v4290_v24, %v659_v53  ;;  %v743_v8 = vmul.f32 %v2903_v52, %v715_v46  ;;  %v694_v17 = vsel %vm690_vm15, %v689_v1, %v686_v42 }
 0x3fb   : > { %3604 = vtanh.f32 %v929_v4  ;;  %v748_v22 = vadd.f32 %v744_v12, %v736_v0  ;;  %v718_v42 = vmul.f32 %v4313_v11, %v694_v17 }
 0x3fd   : > { %v746_v46 = vmul.f32 %v2903_v52, %v718_v42 }
 0x405   : > { %v3599_v15 = vpop.eup %3598 }
 0x406   : > { %v3601_v29 = vpop.eup %3600  ;;  %v935_v23 = vadd.f32 1.0, %v3599_v15  ;;  %v735_v15 = vadd.f32 %v731_v39, %v723_v51 }
 0x407   : > { %v3603_v18 = vpop.eup %3602  ;;  %v936_v35 = vadd.f32 1.0, %v3601_v29  ;;  %v734_v29 = vmul.f32 %v4350_v13, %v2902_v30 }
 0x408   : > { %v938_v37 = vadd.f32 1.0, %v3603_v18  ;;  %v3605_v43 = vpop.eup %3604  ;;  %v4371_v57 = vmul.f32 %v935_v23, %v907_v32  ;;  %v691_v18 = vsel %vm690_vm15, %v688_v21, %v689_v1  ;;  %v726_v32 = vmul.f32 %v2901_v26, %v685_v10  ;;  %v2920_v1 = vld [vmem:[%s4006_s12 + $0xa] ss:$0 sm:$0xff] }
 0x409   : > { %v4375_v6 = vmul.f32 %v936_v35, %v908_v54  ;;  %v937_v38 = vadd.f32 1.0, %v3605_v43  ;;  %v725_v35 = vmul.f32 %v2901_v26, %v684_v14  ;;  %v747_v43 = vadd.f32 %v743_v8, %v735_v15  ;;  %v2919_v26 = vld [vmem:[%s4006_s12 + $0x9] ss:$0 sm:$0xff]  ;;  %v2905_v8 = vld [vmem:[%s4001_s16 + $0x10] ss:$0 sm:$0xff] }
 0x40a   : > { %v4377_v33 = vmul.f32 %v938_v37, %v910_v62  ;;  %v948_v60 = vrot.slane %v4371_v57, 7  ;;  %v2904_v37 = vld [vmem:[%s4001_s16] ss:$0 sm:$0xff]  ;;  %v960_v21 = vrot.slane %v4371_v57, 1  ;;  %v717_v47 = vmul.f32 %v4332_v16, %v691_v18 }
 0x40b   : > { %v949_v2 = vrot.slane %v4375_v6, 7  ;;  %v4391_v4 = vmul.f32 %v937_v38, %v909_v63  ;;  %v961_v30 = vrot.slane %v4375_v6, 1  ;;  %v756_v62 = vadd.f32 %v2904_v37, %v748_v22  ;;  %v2186_v38 = vpop.xlane.xlu0 %2185 }
 0x40c   : > { %v951_v3 = vrot.slane %v4377_v33, 7  ;;  %v737_v61 = vadd.f32 %v733_v28, %v725_v35  ;;  %v755_v51 = vadd.f32 %v2904_v37, %v747_v43  ;;  %v745_v7 = vmul.f32 %v2903_v52, %v717_v47 }
 0x40d   : > { %v954_v59 = vsel %vm657_vm14, %v948_v60, %v949_v2  ;;  %v962_v50 = vrot.slane %v4391_v4, 1  ;;  %v950_v54 = vrot.slane %v4391_v4, 7  ;;  %v966_v39 = vsel %vm690_vm15, %v960_v21, %v961_v30 }
 0x40e   : > { %v955_v23 = vsel %vm657_vm14, %v951_v3, %v948_v60  ;;  %v957_v44 = vmul.f32 %v954_v59, %v4284_v19  ;;  %v738_v19 = vadd.f32 %v734_v29, %v726_v32  ;;  %v985_v60 = vmul.f32 %v2919_v26, %v4375_v6 }
 0x40f   : > { %v956_v55 = vmul.f32 %v955_v23, %v4303_v58  ;;  %v965_v48 = vsel %vm690_vm15, %v961_v30, %v962_v50  ;;  %v952_v63 = vsel %vm657_vm14, %v950_v54, %v951_v3  ;;  %v760_v0 = vsub.f32 %v756_v62, %v4344_v5  ;;  %v2188_v18 = vpop.xlane.xlu0 %2187 }
 0x410   : > { %v977_v27 = vmul.f32 %v2918_v45, %v957_v44  ;;  %v969_v53 = vmul.f32 %v965_v48, %v4300_v56  ;;  %v963_v12 = vrot.slane %v4377_v33, 1  ;;  %v968_v10 = vmul.f32 %v966_v39, %v4296_v49 }
 0x411   : > { %v976_v58 = vmul.f32 %v2918_v45, %v956_v55  ;;  %v984_v14 = vmul.f32 %v2919_v26, %v4371_v57  ;;  %v953_v52 = vsel %vm657_vm14, %v949_v2, %v950_v54  ;;  %v750_v56 = vadd.f32 %v746_v46, %v738_v19 }
 0x412   : > { %v989_v15 = vadd.f32 %v985_v60, %v977_v27  ;;  %v749_v59 = vadd.f32 %v745_v7, %v737_v61  ;;  %v959_v3 = vmul.f32 %v952_v63, %v4286_v20  ;;  %v2192_v17 = vadd.f32 1e-06, %v2186_v38  ;;  %v2921_v20 = vld [vmem:[%s4001_s16 + $0x6] ss:$0 sm:$0xff] }
 0x413   : > { %v2184_v6 = vpop.xlane.xlu1 %2183  ;;  %v988_v29 = vadd.f32 %v984_v14, %v976_v58  ;;  %v997_v28 = vmul.f32 %v2920_v1, %v969_v53  ;;  %v759_v22 = vsub.f32 %v755_v51, %v4347_v9  ;;  %v967_v49 = vsel %vm690_vm15, %v963_v12, %v960_v21  ;;  %v2190_v48 = vpop.xlane.xlu0 %2189 }
 0x414   : > { %v958_v57 = vmul.f32 %v953_v52, %v4290_v24  ;;  %v768_v2 = vmul.f32 %v2905_v8, %v760_v0  ;;  %v996_v23 = vmul.f32 %v2920_v1, %v968_v10  ;;  %v964_v32 = vsel %vm690_vm15, %v962_v50, %v963_v12 }
 0x415   : > { %v2191_v35 = vadd.f32 1e-06, %v2184_v6  ;;  %v1001_v43 = vadd.f32 %v997_v28, %v989_v15  ;;  %v758_v44 = vadd.f32 %v2904_v37, %v750_v56  ;;  %v979_v42 = vmul.f32 %v2918_v45, %v959_v3 }
 0x416   : > { %v1000_v30 = vadd.f32 %v996_v23, %v988_v29  ;;  %v757_v47 = vadd.f32 %v2904_v37, %v749_v59  ;;  %3606 = vrcp.f32 %v2192_v17  ;;  %v767_v55 = vmul.f32 %v2905_v8, %v759_v22 }
 0x417   : > { %v971_v54 = vmul.f32 %v967_v49, %v4313_v11  ;;  %v970_v21 = vmul.f32 %v964_v32, %v4332_v16  ;;  %v978_v62 = vmul.f32 %v2918_v45, %v958_v57  ;;  %v987_v24 = vmul.f32 %v2919_v26, %v4377_v33 }
 0x418   : > { %3608 = vrcp.f32 %v2191_v35  ;;  %v772_v34 = vadd.f32 %v4344_v5, %v768_v2  ;;  %v1009_v50 = vadd.f32 %v2921_v20, %v1001_v43  ;;  %v762_v19 = vsub.f32 %v758_v44, %v4350_v13 }
 0x419   : > { %v986_v61 = vmul.f32 %v2919_v26, %v4391_v4  ;;  %v991_v27 = vadd.f32 %v987_v24, %v979_v42  ;;  %v761_v37 = vsub.f32 %v757_v47, %v4356_v25  ;;  %v771_v38 = vadd.f32 %v4347_v9, %v767_v55  ;;  %v2963_v26 = vld [vmem:[%s4001_s16 + $0x2] ss:$0 sm:$0xff] }
 0x41a   : > { %v1008_v11 = vadd.f32 %v2921_v20, %v1000_v30  ;;  %v998_v45 = vmul.f32 %v2920_v1, %v970_v21  ;;  %v2194_v46 = vadd.f32 1e-06, %v2190_v48  ;;  %v999_v33 = vmul.f32 %v2920_v1, %v971_v54 }
 0x41b   : > { %v990_v16 = vadd.f32 %v986_v61, %v978_v62  ;;  %v1013_v51 = vadd.f32 %v1009_v50, %v772_v34  ;;  %v2193_v39 = vadd.f32 1e-06, %v2188_v18  ;;  %v770_v7 = vmul.f32 %v2905_v8, %v762_v19  ;;  %v3550_v19 = vld [vmem:[%s3990_s21 + $0x19c] ss:$28 sps:$4 sm:$0xff]   ;;  %v3551_v61 = vld [vmem:[%s3990_s21 + $0x164] ss:$28 sps:$4 sm:$0xff]  }
 0x41c   : > { %v1003_v5 = vadd.f32 %v999_v33, %v991_v27  ;;  %v1012_v58 = vadd.f32 %v1008_v11, %v771_v38  ;;  %3610 = vrcp.f32 %v2194_v46  ;;  %v769_v60 = vmul.f32 %v2905_v8, %v761_v37  ;;  %3322 = vmatprep.subr.bf16.mxu1 %v3550_v19  ;;  %v3552_v27 = vld [vmem:[%s3990_s21 + $0x12c] ss:$28 sps:$4 sm:$0xff]   ;;  %v3553_v37 = vld [vmem:[%s3990_s21 + $0xf4] ss:$28 sps:$4 sm:$0xff]   ;;  %v3554_v38 = vld [vmem:[%s3990_s21 + $0xbc] ss:$28 sps:$4 sm:$0xff]  }
 0x41d   : > { %v1002_v53 = vadd.f32 %v998_v45, %v990_v16  ;;  %v1477_v4 = vadd.f32 %v4244_v41, %v1013_v51  ;;  %3612 = vrcp.f32 %v2193_v39  ;;  %v774_v9 = vadd.f32 %v4350_v13, %v770_v7  ;;  %3323 = vmatpush3.bf16.msra.mxu1 %v3550_v19  ;;  %v3555_v11 = vld [vmem:[%s3990_s21 + $0x84] ss:$28 sps:$4 sm:$0xff]   ;;  %v3556_v16 = vld [vmem:[%s3990_s21 + $0x4c] ss:$28 sps:$4 sm:$0xff]   ;;  %v3557_v45 = vld [vmem:[%s3990_s21 + $0x14] ss:$28 sps:$4 sm:$0xff]  }
 0x41e   : > { %v1011_v63 = vadd.f32 %v2921_v20, %v1003_v5  ;;  %v1476_v0 = vadd.f32 %v4235_v31, %v1012_v58  ;;  %v773_v1 = vadd.f32 %v4356_v25, %v769_v60  ;;  %3324 = vmatprep.subr.bf16.mxu1 %v3551_v61 }
 0x41f   : > { %v1010_v14 = vadd.f32 %v2921_v20, %v1002_v53  ;;  %v1486_v15 = vadd.f32 %v2963_v26, %v1477_v4 }
 0x420   : > { %v1015_v6 = vadd.f32 %v1011_v63, %v774_v9  ;;  %v1485_v41 = vadd.f32 %v2963_v26, %v1476_v0  ;;  %v2999_v0 = vld [vmem:[%s4001_s16 + $0xc] ss:$0 sm:$0xff] }
 0x421   : > { %v1014_v29 = vadd.f32 %v1010_v14, %v773_v1  ;;  %3325 = vmatpush3.bf16.msra.mxu1 %v3551_v61 }
 0x422   : > { %v1479_v13 = vadd.f32 %v4240_v36, %v1015_v6  ;;  %3326 = vmatprep.subr.bf16.mxu1 %v3552_v27 }
 0x423   : > { %v3607_v12 = vpop.eup %3606  ;;  %v1478_v31 = vadd.f32 %v4233_v40, %v1014_v29 }
 0x424   : > { %v1488_v22 = vadd.f32 %v2963_v26, %v1479_v13 }
 0x425   : > { %v3609_v56 = vpop.eup %3608  ;;  %v1487_v32 = vadd.f32 %v2963_v26, %v1478_v31  ;;  %3327 = vmatpush3.bf16.msra.mxu1 %v3552_v27 }
 0x426   : > { %3328 = vmatprep.subr.bf16.mxu1 %v3553_v37 }
 0x429   : > { %v3611_v18 = vpop.eup %3610  ;;  %3329 = vmatpush3.bf16.msra.mxu1 %v3553_v37 }
 0x42a   : > { %v3613_v49 = vpop.eup %3612  ;;  %3330 = vmatprep.subr.bf16.mxu1 %v3554_v38 }
 0x42d   : > { %3331 = vmatpush3.bf16.msra.mxu1 %v3554_v38 }
 0x42e   : > { %3332 = vmatprep.subr.bf16.mxu1 %v3555_v11 }
 0x431   : > { %3333 = vmatpush3.bf16.msra.mxu1 %v3555_v11 }
 0x432   : > { %3334 = vmatprep.subr.bf16.mxu1 %v3556_v16 }
 0x435   : > { %3335 = vmatpush3.bf16.msra.mxu1 %v3556_v16 }
 0x436   : > { %3336 = vmatprep.subr.bf16.mxu1 %v3557_v45 }
 0x439   : > { %3337 = vmatpush3.bf16.msra.mxu1 %v3557_v45 }
 0x493   : > { %v3286_v10 = vpop.f32.mrf.mxu1 }
 0x494   : > { %v2198_v52 = vmul.f32 %v3607_v12, %v3286_v10 }
 0x495   : > { %v2081_v59 = vpop.f32.mrf.mxu1 }
 0x496   : > { %v2196_v8 = vmul.f32 %v3609_v56, %v2081_v59  ;;  %v2204_v3 = vadd.f32 %v2198_v52, %v1486_v15  ;;  %v3000_v52 = vld [vmem:[%s4001_s16 + $0xd] ss:$0 sm:$0xff] }
 0x498   : > { %2211 = vadd.xlane.f32.xlu0 %v2204_v3  ;;  %v2203_v17 = vadd.f32 %v2196_v8, %v1485_v41 }
 0x49a   : > { %2209 = vadd.xlane.f32.xlu1 %v2203_v17 }
 0x49c   : > { %v3321_v28 = vpop.f32.mrf.mxu0 }
 0x49d   : > { %v2202_v25 = vmul.f32 %v3611_v18, %v3321_v28 }
 0x49e   : > { %v2156_v57 = vpop.f32.mrf.mxu0 }
 0x49f   : > { %v2200_v2 = vmul.f32 %v3613_v49, %v2156_v57  ;;  %v2206_v23 = vadd.f32 %v2202_v25, %v1488_v22  ;;  %v3558_v25 = vld [vmem:[%s3990_s21 + $0x1a0] ss:$28 sps:$4 sm:$0xff]   ;;  %v3559_v22 = vld [vmem:[%s3990_s21 + $0x168] ss:$28 sps:$4 sm:$0xff]   ;;  %v3560_v49 = vld [vmem:[%s3990_s21 + $0x130] ss:$28 sps:$4 sm:$0xff]  }
 0x4a0   : > { %3342 = vmatprep.subr.bf16.mxu0 %v3558_v25  ;;  %v3561_v57 = vld [vmem:[%s3990_s21 + $0xf8] ss:$28 sps:$4 sm:$0xff]  }
 0x4a1   : > { %2215 = vadd.xlane.f32.xlu0 %v2206_v23  ;;  %v2205_v35 = vadd.f32 %v2200_v2, %v1487_v32  ;;  %3343 = vmatpush3.bf16.msra.mxu0 %v3558_v25  ;;  %v3562_v2 = vld [vmem:[%s3990_s21 + $0xc0] ss:$28 sps:$4 sm:$0xff]   ;;  %v3564_v32 = vld [vmem:[%s3990_s21 + $0x50] ss:$28 sps:$4 sm:$0xff]  }
 0x4a2   : > { %3344 = vmatprep.subr.bf16.mxu0 %v3559_v22 }
 0x4a3   : > { %2213 = vadd.xlane.f32.xlu1 %v2205_v35 }
 0x4a5   : > { %3345 = vmatpush3.bf16.msra.mxu0 %v3559_v22 }
 0x4a6   : > { %3346 = vmatprep.subr.bf16.mxu0 %v3560_v49 }
 0x4a9   : > { %3347 = vmatpush3.bf16.msra.mxu0 %v3560_v49 }
 0x4aa   : > { %3348 = vmatprep.subr.bf16.mxu0 %v3561_v57 }
 0x4ad   : > { %3349 = vmatpush3.bf16.msra.mxu0 %v3561_v57 }
 0x4ae   : > { %3350 = vmatprep.subr.bf16.mxu0 %v3562_v2 }
 0x4b1   : > { %3351 = vmatpush3.bf16.msra.mxu0 %v3562_v2 }
 0x521   : > { %v2212_v43 = vpop.xlane.xlu0 %2211 }
 0x522   : > { %v2218_v44 = vmul.f32 0.0078125, %v2212_v43  ;;  %v3001_v43 = vld [vmem:[%s4001_s16 + $0xa] ss:$0 sm:$0xff] }
 0x523   : > { %v2210_v20 = vpop.xlane.xlu1 %2209 }
 0x524   : > { %v2222_v42 = vsub.f32 %v2204_v3, %v2218_v44  ;;  %v2217_v36 = vmul.f32 0.0078125, %v2210_v20 }
 0x526   : > { %v2221_v30 = vsub.f32 %v2203_v17, %v2217_v36  ;;  %v2226_v40 = vmul.f32 %v2222_v42, %v2222_v42 }
 0x528   : > { %2231 = vadd.xlane.f32.xlu0 %v2226_v40  ;;  %v2225_v47 = vmul.f32 %v2221_v30, %v2221_v30 }
 0x52a   : > { %v2216_v55 = vpop.xlane.xlu0 %2215  ;;  %2229 = vadd.xlane.f32.xlu1 %v2225_v47 }
 0x52b   : > { %v2220_v54 = vmul.f32 0.0078125, %v2216_v55 }
 0x52c   : > { %v2214_v21 = vpop.xlane.xlu1 %2213 }
 0x52d   : > { %v2224_v62 = vsub.f32 %v2206_v23, %v2220_v54  ;;  %v2219_v24 = vmul.f32 0.0078125, %v2214_v21  ;;  %v3563_v23 = vld [vmem:[%s3990_s21 + $0x88] ss:$28 sps:$4 sm:$0xff]  }
 0x52e   : > { %3352 = vmatprep.subr.bf16.mxu0 %v3563_v23 }
 0x52f   : > { %v2223_v48 = vsub.f32 %v2205_v35, %v2219_v24  ;;  %v2228_v34 = vmul.f32 %v2224_v62, %v2224_v62  ;;  %3353 = vmatpush3.bf16.msra.mxu0 %v3563_v23  ;;  %v3565_v35 = vld [vmem:[%s3990_s21 + $0x18] ss:$28 sps:$4 sm:$0xff]   ;;  %s4576_s21 = sld [smem:[#allocation17_spill]] (!%p3021_p13) }
 0x530   : > { %3354 = vmatprep.subr.bf16.mxu0 %v3564_v32 }
 0x531   : > { %2235 = vadd.xlane.f32.xlu0 %v2228_v34  ;;  %v2227_v50 = vmul.f32 %v2223_v48, %v2223_v48 }
 0x533   : > { %2233 = vadd.xlane.f32.xlu1 %v2227_v50  ;;  %3355 = vmatpush3.bf16.msra.mxu0 %v3564_v32 }
 0x534   : > { %3356 = vmatprep.subr.bf16.mxu0 %v3565_v35 }
 0x537   : > { %3357 = vmatpush3.bf16.msra.mxu0 %v3565_v35 }
 0x5b1   : > { %v2232_v46 = vpop.xlane.xlu0 %2231 }
 0x5b2   : > { %v2238_v33 = vmul.f32 0.0078125, %v2232_v46 }
 0x5b3   : > { %v2230_v51 = vpop.xlane.xlu1 %2229 }
 0x5b4   : > { %v2242_v39 = vadd.f32 1e-05, %v2238_v33  ;;  %v2237_v7 = vmul.f32 0.0078125, %v2230_v51 }
 0x5b6   : > { %3614 = vrsqrt.f32 %v2242_v39  ;;  %v2241_v5 = vadd.f32 1e-05, %v2237_v7 }
 0x5b8   : > { %3616 = vrsqrt.f32 %v2241_v5 }
 0x5ba   : > { %v2236_v58 = vpop.xlane.xlu0 %2235 }
 0x5bb   : > { %v2240_v53 = vmul.f32 0.0078125, %v2236_v58 }
 0x5bc   : > { %v2234_v60 = vpop.xlane.xlu1 %2233 }
 0x5bd   : > { %v2244_v4 = vadd.f32 1e-05, %v2240_v53  ;;  %v2239_v26 = vmul.f32 0.0078125, %v2234_v60 }
 0x5bf   : > { %3618 = vrsqrt.f32 %v2244_v4  ;;  %v2243_v9 = vadd.f32 1e-05, %v2239_v26 }
 0x5c1   : > { %3620 = vrsqrt.f32 %v2243_v9 }
 0x5c3   : > { %v3615_v63 = vpop.eup %3614 }
 0x5c4   : > { %v2250_v12 = vmul.f32 %v3615_v63, %v2222_v42 }
 0x5c5   : > { %v3617_v10 = vpop.eup %3616 }
 0x5c6   : > { %v2249_v1 = vmul.f32 %v3617_v10, %v2221_v30  ;;  %v2258_v14 = vmul.f32 %v2999_v0, %v2250_v12 }
 0x5c8   : > { %v2257_v15 = vmul.f32 %v2999_v0, %v2249_v1  ;;  %v4467_v59 = vadd.f32 %v3000_v52, %v2258_v14 }
 0x5ca   : > { %v4465_v56 = vadd.f32 %v3000_v52, %v2257_v15 }
 0x5cc   : > { %v3619_v6 = vpop.eup %3618  ;;  %v2269_v8 = vpack.c.bf16 %v4467_v59, %v4465_v56 }
 0x5cd   : > { %v2252_v3 = vmul.f32 %v3619_v6, %v2224_v62 }
 0x5ce   : > { %v3621_v41 = vpop.eup %3620  ;;  %3338 = vmatprep.mubr.bf16.mxu1 %v2269_v8 }
 0x5cf   : > { %v2251_v29 = vmul.f32 %v3621_v41, %v2223_v48  ;;  %v2260_v17 = vmul.f32 %v2999_v0, %v2252_v3 }
 0x5d1   : > { %v2259_v13 = vmul.f32 %v2999_v0, %v2251_v29  ;;  %v4473_v18 = vadd.f32 %v3000_v52, %v2260_v17 }
 0x5d3   : > { %v4471_v31 = vadd.f32 %v3000_v52, %v2259_v13 }
 0x5d5   : > { %v2270_v28 = vpack.c.bf16 %v4473_v18, %v4471_v31 }
 0x5d7   : > { %3339 = vmatmul.mubr.bf16.vlgmr.msra.gmra.mxu1 %v2270_v28  ;;  %v3018_v28 = vld [vmem:[%s4001_s16 + $0xb] ss:$0 sm:$0xff] }
 0x697   : > { %v3340_v44 = vpop.f32.mrf.mxu1 }
 0x698   : > { %v2383_v20 = vadd.f32 %v3340_v44, %v3001_v43 }
 0x699   : > { %v2374_v42 = vpop.f32.mrf.mxu1 }
 0x69a   : > { %v2395_v36 = vmul.f32 0.044715, %v2383_v20  ;;  %v2375_v30 = vadd.f32 %v3001_v43, %v2374_v42  ;;  %v2391_v1 = vmul.f32 0.5, %v2383_v20 }
 0x69b   : > { %v3341_v40 = vpop.f32.mrf.mxu1 }
 0x69c   : > { %v2399_v47 = vmul.f32 %v2395_v36, %v2383_v20  ;;  %v2393_v55 = vmul.f32 0.044715, %v2375_v30  ;;  %v2386_v54 = vadd.f32 %v3341_v40, %v3001_v43  ;;  %v2389_v0 = vmul.f32 0.5, %v2375_v30 }
 0x69d   : > { %v2377_v21 = vpop.f32.mrf.mxu1 }
 0x69e   : > { %v2403_v62 = vmul.f32 %v2399_v47, %v2383_v20  ;;  %v2397_v24 = vmul.f32 %v2393_v55, %v2375_v30  ;;  %v2396_v48 = vmul.f32 0.044715, %v2386_v54  ;;  %v2378_v34 = vadd.f32 %v3001_v43, %v2377_v21 }
 0x69f   : > { %v2392_v9 = vmul.f32 0.5, %v2386_v54 }
 0x6a0   : > { %v2407_v50 = vadd.f32 %v2403_v62, %v2383_v20  ;;  %v2401_v19 = vmul.f32 %v2397_v24, %v2375_v30  ;;  %v2400_v61 = vmul.f32 %v2396_v48, %v2386_v54  ;;  %v2394_v27 = vmul.f32 0.044715, %v2378_v34 }
 0x6a1   : > { %v2390_v12 = vmul.f32 0.5, %v2378_v34 }
 0x6a2   : > { %v2404_v37 = vmul.f32 %v2400_v61, %v2386_v54  ;;  %v2398_v38 = vmul.f32 %v2394_v27, %v2378_v34  ;;  %v2405_v11 = vadd.f32 %v2401_v19, %v2375_v30  ;;  %v2411_v16 = vmul.f32 0.7978846, %v2407_v50 }
 0x6a4   : > { %v2408_v45 = vadd.f32 %v2404_v37, %v2386_v54  ;;  %v2402_v46 = vmul.f32 %v2398_v38, %v2378_v34  ;;  %v2409_v33 = vmul.f32 0.7978846, %v2405_v11 }
 0x6a6   : > { %v2412_v51 = vmul.f32 0.7978846, %v2408_v45  ;;  %v2406_v39 = vadd.f32 %v2402_v46, %v2378_v34  ;;  %3622 = vtanh.f32 %v2409_v33  ;;  %v3019_v33 = vld [vmem:[%s4001_s16 + $0xe] ss:$0 sm:$0xff] }
 0x6a7   : > { %3624 = vtanh.f32 %v2411_v16 }
 0x6a8   : > { %3626 = vtanh.f32 %v2412_v51  ;;  %v2410_v7 = vmul.f32 0.7978846, %v2406_v39  ;;  %v3020_v39 = vld [vmem:[%s4001_s16 + $0xf] ss:$0 sm:$0xff] }
 0x6aa   : > { %3628 = vtanh.f32 %v2410_v7 }
 0x6b3   : > { %v3623_v5 = vpop.eup %3622 }
 0x6b4   : > { %v3625_v58 = vpop.eup %3624  ;;  %v2417_v60 = vadd.f32 1.0, %v3623_v5 }
 0x6b5   : > { %v3627_v53 = vpop.eup %3626  ;;  %v2419_v63 = vadd.f32 1.0, %v3625_v58 }
 0x6b6   : > { %v2420_v4 = vadd.f32 1.0, %v3627_v53  ;;  %v2421_v52 = vmul.f32 %v2417_v60, %v2389_v0 }
 0x6b7   : > { %v3629_v26 = vpop.eup %3628  ;;  %v2423_v6 = vmul.f32 %v2419_v63, %v2391_v1 }
 0x6b8   : > { %v2418_v10 = vadd.f32 1.0, %v3629_v26  ;;  %v2424_v14 = vmul.f32 %v2420_v4, %v2392_v9 }
 0x6ba   : > { %v2422_v15 = vmul.f32 %v2418_v10, %v2390_v12  ;;  %v2426_v3 = vpack.c.bf16 %v2424_v14, %v2423_v6 }
 0x6bc   : > { %v2425_v8 = vpack.c.bf16 %v2422_v15, %v2421_v52 }
 0x6be   : > { %3358 = vmatprep.mubr.bf16.mxu0 %v2425_v8 }
 0x6bf   : > { %3359 = vmatmul.mubr.bf16.vlgmr.msra.gmra.mxu0 %v2426_v3 }
 0x77f   : > { %v3360_v41 = vpop.f32.mrf.mxu0 }
 0x780   : > { %v2542_v25 = vadd.f32 %v3360_v41, %v4471_v31 }
 0x781   : > { %v2525_v29 = vpop.f32.mrf.mxu0 }
 0x782   : > { %v2540_v17 = vadd.f32 %v2525_v29, %v4465_v56  ;;  %v2551_v23 = vadd.f32 %v3018_v28, %v2542_v25 }
 0x783   : > { %v3361_v13 = vpop.f32.mrf.mxu0 }
 0x784   : > { %v2549_v22 = vadd.f32 %v3018_v28, %v2540_v17  ;;  %v2543_v2 = vadd.f32 %v3361_v13, %v4473_v18 }
 0x785   : > { %v2528_v49 = vpop.f32.mrf.mxu0 }
 0x786   : > { %v2541_v57 = vadd.f32 %v2528_v49, %v4467_v59  ;;  %2555 = vadd.xlane.f32.xlu1 %v2549_v22  ;;  %v2552_v35 = vadd.f32 %v3018_v28, %v2543_v2 }
 0x788   : > { %v2550_v32 = vadd.f32 %v3018_v28, %v2541_v57 }
 0x78a   : > { %2559 = vadd.xlane.f32.xlu1 %v2551_v23  ;;  %2557 = vadd.xlane.f32.xlu0 %v2550_v32 }
 0x78e   : > { %2561 = vadd.xlane.f32.xlu0 %v2552_v35 }
 0x80f   : > { %v2556_v43 = vpop.xlane.xlu1 %2555 }
 0x810   : > { %v2563_v44 = vmul.f32 0.0078125, %v2556_v43 }
 0x812   : > { %v2567_v56 = vsub.f32 %v2549_v22, %v2563_v44 }
 0x813   : > { %v2560_v20 = vpop.xlane.xlu1 %2559  ;;  %v2558_v42 = vpop.xlane.xlu0 %2557 }
 0x814   : > { %v2565_v36 = vmul.f32 0.0078125, %v2560_v20  ;;  %v2564_v31 = vmul.f32 0.0078125, %v2558_v42  ;;  %v2571_v30 = vmul.f32 %v2567_v56, %v2567_v56 }
 0x816   : > { %v2569_v40 = vsub.f32 %v2551_v23, %v2565_v36  ;;  %v2568_v47 = vsub.f32 %v2550_v32, %v2564_v31  ;;  %2575 = vadd.xlane.f32.xlu1 %v2571_v30 }
 0x817   : > { %v2562_v59 = vpop.xlane.xlu0 %2561 }
 0x818   : > { %v2566_v55 = vmul.f32 0.0078125, %v2562_v59  ;;  %v2573_v18 = vmul.f32 %v2569_v40, %v2569_v40  ;;  %v2572_v54 = vmul.f32 %v2568_v47, %v2568_v47 }
 0x81a   : > { %v2570_v21 = vsub.f32 %v2552_v35, %v2566_v55  ;;  %2579 = vadd.xlane.f32.xlu1 %v2573_v18  ;;  %2577 = vadd.xlane.f32.xlu0 %v2572_v54 }
 0x81c   : > { %v2574_v62 = vmul.f32 %v2570_v21, %v2570_v21 }
 0x81e   : > { %2581 = vadd.xlane.f32.xlu0 %v2574_v62 }
 0x89f   : > { %v2576_v24 = vpop.xlane.xlu1 %2575 }
 0x8a0   : > { %v2583_v48 = vmul.f32 0.0078125, %v2576_v24 }
 0x8a2   : > { %v2587_v34 = vadd.f32 1e-05, %v2583_v48 }
 0x8a3   : > { %v2580_v50 = vpop.xlane.xlu1 %2579  ;;  %v2578_v19 = vpop.xlane.xlu0 %2577 }
 0x8a4   : > { %3630 = vrsqrt.f32 %v2587_v34  ;;  %v2585_v61 = vmul.f32 0.0078125, %v2580_v50  ;;  %v2584_v27 = vmul.f32 0.0078125, %v2578_v19 }
 0x8a6   : > { %v2589_v37 = vadd.f32 1e-05, %v2585_v61  ;;  %v2588_v38 = vadd.f32 1e-05, %v2584_v27 }
 0x8a7   : > { %v2582_v11 = vpop.xlane.xlu0 %2581 }
 0x8a8   : > { %3632 = vrsqrt.f32 %v2589_v37  ;;  %v2586_v16 = vmul.f32 0.0078125, %v2582_v11 }
 0x8a9   : > { %3634 = vrsqrt.f32 %v2588_v38 }
 0x8aa   : > { %v2590_v45 = vadd.f32 1e-05, %v2586_v16 }
 0x8ac   : > { %3636 = vrsqrt.f32 %v2590_v45 }
 0x8b1   : > { %v3631_v46 = vpop.eup %3630 }
 0x8b2   : > { %v2595_v51 = vmul.f32 %v3631_v46, %v2567_v56 }
 0x8b4   : > { %v2603_v7 = vmul.f32 %v3019_v33, %v2595_v51 }
 0x8b5   : > { %v3633_v5 = vpop.eup %3632 }
 0x8b6   : > { %v3635_v58 = vpop.eup %3634  ;;  %v2611_v53 = vadd.f32 %v3020_v39, %v2603_v7  ;;  %v2597_v60 = vmul.f32 %v3633_v5, %v2569_v40 }
 0x8b7   : > { %v2596_v4 = vmul.f32 %v3635_v58, %v2568_v47 }
 0x8b8   : > { %2615 = vst [vmem:[#allocation2 + $0x10] sm:$0xff] %v2611_v53  ;;  %v2605_v26 = vmul.f32 %v3019_v33, %v2597_v60 }
 0x8b9   : > { %v3637_v9 = vpop.eup %3636  ;;  %v2604_v63 = vmul.f32 %v3019_v33, %v2596_v4 }
 0x8ba   : > { %v2613_v0 = vadd.f32 %v3020_v39, %v2605_v26  ;;  %v2598_v12 = vmul.f32 %v3637_v9, %v2570_v21 }
 0x8bb   : > { %v2612_v10 = vadd.f32 %v3020_v39, %v2604_v63 }
 0x8bc   : > { %2617 = vst [vmem:[#allocation2 + $0x18] sm:$0xff] %v2613_v0  ;;  %v2606_v1 = vmul.f32 %v3019_v33, %v2598_v12  ;;  %2622 = sbr.rel (%p3021_p13) target bundleno = 2473 (0x9a9), region = 72 }
 0x8bd   : > { %2616 = vst [vmem:[#allocation2] sm:$0xff] %v2612_v10 }
 0x8be   : > { %v2614_v14 = vadd.f32 %v3020_v39, %v2606_v1 }
 0x8c0   : > { %2618 = vst [vmem:[#allocation2 + $0x8] sm:$0xff] %v2614_v14 }
 0x8c1   : > { %v3642_v52 = vld [vmem:[%s4557_s6 + $0x38] sm:$0xff]   ;;  %v2623_v15 = vadd.f32 %v2612_v10, %v2611_v53  ;;  %v2630_v6 = vadd.f32 %v2614_v14, %v2613_v0  ;;  %v3830_v8 = vmov 0.0   ;;  %v3643_v3 = vld [vmem:[%s4557_s6 + $0x30] sm:$0xff]   ;;  %vm3831_vm0 = vmmov 0   ;;  %v3644_v28 = vld [vmem:[%s4557_s6 + $0x28] sm:$0xff]  }
 0x8c2   : > { %3362 = vmatprep.subr.bf16.mxu0 %v3830_v8  ;;  %3378 = vmatprep.mubr.msk.bf16.mxu0 %vm3831_vm0, %v3830_v8  ;;  %v3645_v2 = vld [vmem:[%s4557_s6 + $0x20] sm:$0xff]   ;;  %v3646_v44 = vld [vmem:[%s4557_s6 + $0x18] sm:$0xff]   ;;  %v3647_v42 = vld [vmem:[%s4557_s6 + $0x10] sm:$0xff]   ;;  %vm2669_vm1 = vcmask 1041409  }
 0x8c3   : > { %3363 = vmatpush3.bf16.msra.mxu0 %v3642_v52  ;;  %v2624_v41 = vrot.slane %v2623_v15, 4  ;;  %v2631_v29 = vrot.slane %v2630_v6, 4  ;;  %v3648_v30 = vld [vmem:[%s4557_s6 + $0x8] sm:$0xff]   ;;  %v3649_v59 = vld [vmem:[%s4557_s6] sm:$0xff]  }
 0x8c4   : > { %3364 = vmatprep.subr.bf16.mxu0 %v3830_v8  ;;  %v3022_v54 = vld [vmem:[%s4576_s21] ss:$0 sm:$0xff] }
 0x8c5   : > { %v2625_v17 = vadd.f32 %v2624_v41, %v2623_v15  ;;  %v2632_v13 = vadd.f32 %v2631_v29, %v2630_v6 }
 0x8c7   : > { %3365 = vmatpush3.bf16.msra.mxu0 %v3643_v3  ;;  %v2626_v25 = vrot.slane %v2625_v17, 2  ;;  %v2633_v22 = vrot.slane %v2632_v13, 2 }
 0x8c8   : > { %3366 = vmatprep.subr.bf16.mxu0 %v3830_v8 }
 0x8c9   : > { %v2627_v49 = vadd.f32 %v2626_v25, %v2625_v17  ;;  %v2634_v57 = vadd.f32 %v2633_v22, %v2632_v13 }
 0x8cb   : > { %3367 = vmatpush3.bf16.msra.mxu0 %v3644_v28  ;;  %v2628_v23 = vrot.slane %v2627_v49, 1  ;;  %v2635_v32 = vrot.slane %v2634_v57, 1 }
 0x8cc   : > { %3368 = vmatprep.subr.bf16.mxu0 %v3830_v8 }
 0x8cd   : > { %v2629_v35 = vadd.f32 %v2628_v23, %v2627_v49  ;;  %v2636_v43 = vadd.f32 %v2635_v32, %v2634_v57 }
 0x8cf   : > { %3369 = vmatpush3.bf16.msra.mxu0 %v3645_v2  ;;  %v2638_v56 = vmul.f32 0.0625, %v2629_v35  ;;  %v2639_v20 = vmul.f32 0.0625, %v2636_v43 }
 0x8d0   : > { %3370 = vmatprep.subr.bf16.mxu0 %v3830_v8 }
 0x8d1   : > { %v2640_v36 = vpack.c.bf16 %v2638_v56, %v2638_v56  ;;  %v2641_v31 = vpack.c.bf16 %v2639_v20, %v2639_v20 }
 0x8d3   : > { %3371 = vmatpush3.bf16.msra.mxu0 %v3646_v44  ;;  %v2667_v40 = vunpack.c.l.b16 %v2640_v36  ;;  %v2668_v47 = vunpack.c.l.b16 %v2641_v31 }
 0x8d4   : > { %3372 = vmatprep.subr.bf16.mxu0 %v3830_v8 }
 0x8d5   : > { %v2670_v55 = vsel %vm2669_vm1, %v2668_v47, %v2667_v40 }
 0x8d6   : > { %v2671_v18 = vpack.c.b16 %v2670_v55, %v2670_v55 }
 0x8d7   : > { %3373 = vmatpush3.bf16.msra.mxu0 %v3647_v42 }
 0x8d8   : > { %3374 = vmatprep.subr.bf16.mxu0 %v3830_v8 }
 0x8db   : > { %3375 = vmatpush3.bf16.msra.mxu0 %v3648_v30 }
 0x8dc   : > { %3376 = vmatprep.subr.bf16.mxu0 %v3830_v8 }
 0x8df   : > { %3377 = vmatpush3.bf16.msra.mxu0 %v3649_v59 }
 0x8e2   : > { %3379 = vmatmul.mubr.bf16.vlgmr.msra.gmra.mxu0 %v2671_v18 }
 0x9a2   : > { %v2755_v21 = vpop.f32.mrf.mxu0 }
 0x9a3   : > { %v2756_v62 = vadd.f32 %v3022_v54, %v2755_v21 }
 0x9a4   : > { %v3380_v24 = vpop.f32.mrf.mxu0 }
 0x9a5   : > { %2761 = vst [vmem:[#allocation11] sm:$0x3] %v2756_v62 }
 0x9a6   : > { %v2758_v48 = vpop.f32.mrf.mxu0 }
 0x9a8   : > { %v3381_v34 = vpop.f32.mrf.mxu0 }
 0x9a9 PF: > { %p3417_p7 = scmp.eq.s32.totalorder %s3907_s11, 1  ;;  %s3832_s16 = smov [#allocation11]  }
 0x9aa   : > { %s2771_s12 = sshll.u32 %s3832_s16, 4  ;;  %s2772_s12 = int_to_ptr.vmem [resolvable:$true] %s2771_s12 }
 0x9ab   : > { %s3730_s24 = scalar_lea.vmem %s2772_s12, 32  ;;  %p3737_p0 = scmp.lt.s32.totalorder %s2772_s12, %s2772_s12 }
 0x9ac   : > { %p3731_p9 = scmp.ne.s32.totalorder %s2772_s12, %s3730_s24  ;;  %p3738_p1 = scmp.lt.s32.totalorder %s3730_s24, %s3730_s24 }
 0x9ae   : > { %p3732_p4 = pnand %p3731_p9, %p3417_p7  ;;  %p3739_p5 = por %p3738_p1, %p3737_p0 }
 0x9b0   : > { %p3733_p10 = pneg %p3732_p4 }
 0x9b2   : > { %p3740_p2 = pnand %p3739_p5, %p3733_p10 }
 0x9b4   : > { %3743 = shalt.err (!%p3740_p2)
}
 0x9b5   : > { %s4577_s0 = sld [smem:[#allocation18_spill]] }
 0x9bb   : > { %3398 = dma.vmem_to_hbm [thread:$0]  (%p3417_p7), %s2772_s12, 32, %s4577_s0, [#allocation7]  }
 0x9bc   : > { %3791 = dma.done.wait (%p3417_p7), [#allocation7], 32  }
 0x9bd   : > { %3793 = vsyncadd (%p3417_p7), [#allocation7], 4294967264 }
 0x9be PF: > { %s21_s10 = sadd.s32 1, %s3816_s10   ;;  %s4578_s7 = smov %s3972_s27 }
 0x9bf   : > { %p18_p3 = scmp.ge.s32.totalorder %s21_s10, 4   ;;  %s4579_s27 = smov %s3800_s28 }
 0x9c0   : > { %s4580_s28 = smov %s3804_s29  ;;  %s4581_s29 = smov %s4578_s7 }
 0x9c1   : > { %s4582_s30 = smov %s3812_s9  ;;  %s4583_s9 = smov %s4585_s22 }
 0x9c2   :  { %20 = sbr.rel (!%p18_p3) target bundleno = 9 (0x9), region = 115 }
 0x9c7   :  { %2784 = vsyncpa [#allocation6], 1 }
 0x9c8   :  { %2786 = vsyncpa [#allocation6 + $0x1], 1 }
 0x9c9   :  { %2787 = vsyncpa [#allocation9], 1 }
 0x9ca   :  { %2788 = vsyncpa [#allocation7], 1 }
 0x9cb   :  { %2790 = vsyncpa [#allocation7 + $0x1], 1 }

</bundles_post_ra>
